<compile_context>
chip_gen: v7x
topology: tpu7x:2x2x1
jax: 0.10.0
libtpu: 0.0.40
codegen_flags: <defaults>
</compile_context>

<pallas_src>
import functools

import jax
import jax.numpy as jnp
from jax.experimental import pallas as pl
from jax.experimental.pallas import tpu as pltpu

OUT_PAD = 128  # lane-dense width for the padded (q1, q2) output store


def _elu(x):
    # F.elu, alpha=1.0; exp only on the clamped non-positive branch.
    return jnp.where(x > 0.0, x, jnp.exp(jnp.minimum(x, 0.0)) - 1.0)


def _avg_l1_norm(x, eps=1e-8):
    m = jnp.maximum(jnp.mean(jnp.abs(x), axis=-1, keepdims=True), eps)
    return x * pl.reciprocal(m, approx=True)   # EUP slot; VPU stays free


def _critic_kernel(state_ref, action_ref, zsa_ref, zs_ref,
                   w0s_ref, w0a_ref, b0_ref,
                   wzsa_ref, wzs_ref,
                   w1h1_ref, b11_ref, w1h2_ref, b12_ref,
                   w21_ref, b21_ref, w22_ref, b22_ref,
                   w3p1_ref, w3p2_ref, b3p_ref,
                   out_ref, *, hdim):
    f32 = jnp.float32
    bf16 = jnp.bfloat16

    # Fused layer 1 (dense out-dim fusion of q01|q02; K-split removes cat([s, a])).
    h = (jnp.dot(state_ref[...].astype(bf16), w0s_ref[...], preferred_element_type=f32)
         + jnp.dot(action_ref[...].astype(bf16), w0a_ref[...], preferred_element_type=f32)
         + b0_ref[...])

    # Fused embedding contribution for both heads (dense; K-split removes cat([zsa, zs])).
    e = (jnp.dot(zsa_ref[...].astype(bf16), wzsa_ref[...], preferred_element_type=f32)
         + jnp.dot(zs_ref[...].astype(bf16), wzs_ref[...], preferred_element_type=f32))

    def q_head(h_half, e_half, w1h, b1, w2, b2, w3p):
        hn = _avg_l1_norm(h_half)                                   # f32
        z = (jnp.dot(hn.astype(bf16), w1h[...], preferred_element_type=f32)
             + e_half + b1[...])
        z = _elu(z)                                                 # f32 (v5e EUP has no bf16)
        z = _elu(jnp.dot(z.astype(bf16), w2[...], preferred_element_type=f32) + b2[...])
        return jnp.dot(z.astype(bf16), w3p[...], preferred_element_type=f32)

    q1 = q_head(h[:, :hdim], e[:, :hdim], w1h1_ref, b11_ref, w21_ref, b21_ref, w3p1_ref)
    q2 = q_head(h[:, hdim:], e[:, hdim:], w1h2_ref, b12_ref, w22_ref, b22_ref, w3p2_ref)

    # Single lane-dense (tb, 128) store; q1 lives in column 0, q2 in column 1, rest zero.
    out_ref[...] = q1 + q2 + b3p_ref[...]


def _choose_tiling(B):
    """Pick batch tile (multiple of 8) and padded batch.

    For large batches we guarantee >= 2 grid steps so the 'parallel' batch axis
    can shard across the two TensorCores on v7x; small batches get one
    sublane-padded tile."""
    if B >= 512:
        tb = 256
    elif B >= 256:
        tb = 128
    else:
        tb = ((B + 7) // 8) * 8
    b_pad = ((B + tb - 1) // tb) * tb
    return tb, b_pad


def critic_forward(state, action, zsa, zs, fused, *, hdim):
    B, state_dim = state.shape
    action_dim = action.shape[1]
    zs_dim = zs.shape[1]
    two_h = 2 * hdim
    sa_dim = state_dim + action_dim

    tb, b_pad = _choose_tiling(B)
    if b_pad != B:
        pad = ((0, b_pad - B), (0, 0))
        state, action, zsa, zs = (jnp.pad(x, pad) for x in (state, action, zsa, zs))
    grid = (b_pad // tb,)

    def row_spec(d):
        return pl.BlockSpec((tb, d), lambda i: (i, 0))

    def whole_spec(shape):
        # Whole-array resident weight; constant index map across the batch grid.
        return pl.BlockSpec(shape, lambda i: (0, 0))

    in_specs = [
        row_spec(state_dim), row_spec(action_dim), row_spec(zs_dim), row_spec(zs_dim),
        whole_spec((state_dim, two_h)), whole_spec((action_dim, two_h)), whole_spec((1, two_h)),
        whole_spec((zs_dim, two_h)), whole_spec((zs_dim, two_h)),
        whole_spec((hdim, hdim)), whole_spec((1, hdim)),
        whole_spec((hdim, hdim)), whole_spec((1, hdim)),
        whole_spec((hdim, hdim)), whole_spec((1, hdim)),
        whole_spec((hdim, hdim)), whole_spec((1, hdim)),
        whole_spec((hdim, OUT_PAD)), whole_spec((hdim, OUT_PAD)), whole_spec((1, OUT_PAD)),
    ]

    # Advisory cost estimate (helps XLA schedule the surrounding training step).
    flops = 2 * b_pad * (sa_dim * two_h + 2 * zs_dim * two_h
                         + 2 * hdim * hdim + 2 * hdim * hdim + 2 * hdim * OUT_PAD)
    transcendentals = b_pad * (4 * hdim + 2)
    w_bytes = (2 * (sa_dim * two_h + 2 * zs_dim * two_h + 4 * hdim * hdim + 2 * hdim * OUT_PAD)
               + 4 * (two_h + 4 * hdim + OUT_PAD))
    bytes_accessed = 4 * b_pad * (sa_dim + 2 * zs_dim + OUT_PAD) + w_bytes

    kernel = functools.partial(_critic_kernel, hdim=hdim)
    out = pl.pallas_call(
        kernel,
        out_shape=jax.ShapeDtypeStruct((b_pad, OUT_PAD), jnp.float32),
        grid=grid,
        in_specs=in_specs,
        out_specs=pl.BlockSpec((tb, OUT_PAD), lambda i: (i, 0)),
        compiler_params=pltpu.CompilerParams(
            dimension_semantics=("parallel",),
            vmem_limit_bytes=32 * 1024 * 1024),
        cost_estimate=pl.CostEstimate(flops=flops, transcendentals=transcendentals,
                                      bytes_accessed=bytes_accessed),
        # TODO(synk): weights never change across grid steps; single-buffering them
        # (pipeline_mode=pl.Buffered(1)) would halve weight VMEM residency on v7x.
    )(state, action, zsa, zs,
      fused["w0s"], fused["w0a"], fused["b0"],
      fused["wzsa"], fused["wzs"],
      fused["w1h1"], fused["b11"], fused["w1h2"], fused["b12"],
      fused["w21"], fused["b21"], fused["w22"], fused["b22"],
      fused["w3p1"], fused["w3p2"], fused["b3p"])
    return out[:B, :2]


# ---------------------------------------------------------------------------
# Parameter construction (PyTorch-style init) + fusion/packing done ONCE here.
# ---------------------------------------------------------------------------

def _init_linear(key, in_dim, out_dim):
    kw, kb = jax.random.split(key)
    bound = 1.0 / jnp.sqrt(jnp.float32(in_dim))
    w = jax.random.uniform(kw, (in_dim, out_dim), jnp.float32, -bound, bound)
    b = jax.random.uniform(kb, (1, out_dim), jnp.float32, -bound, bound)
    return w, b


def make_params(key, state_dim, action_dim, zs_dim, hdim):
    keys = jax.random.split(key, 8)
    sa_dim = state_dim + action_dim
    emb_dim = 2 * zs_dim

    w01, b01 = _init_linear(keys[0], sa_dim, hdim)
    w1, b1 = _init_linear(keys[1], hdim + emb_dim, hdim)   # row order: [h | zsa | zs]
    w2, b2 = _init_linear(keys[2], hdim, hdim)
    w3, b3 = _init_linear(keys[3], hdim, 1)
    w02, b02 = _init_linear(keys[4], sa_dim, hdim)
    w4, b4 = _init_linear(keys[5], hdim + emb_dim, hdim)
    w5, b5 = _init_linear(keys[6], hdim, hdim)
    w6, b6 = _init_linear(keys[7], hdim, 1)

    raw = {"w01": w01, "b01": b01, "w1": w1, "b1": b1, "w2": w2, "b2": b2,
           "w3": w3, "b3": b3, "w02": w02, "b02": b02, "w4": w4, "b4": b4,
           "w5": w5, "b5": b5, "w6": w6, "b6": b6}

    bf16 = jnp.bfloat16
    # Dense out-dim fusion only (no zero-padded block-diagonals).
    w0 = jnp.concatenate([w01, w02], axis=1)            # (sa_dim, 2h)
    b0 = jnp.concatenate([b01, b02], axis=1)            # (1, 2h)
    wzsa = jnp.concatenate([w1[hdim:hdim + zs_dim], w4[hdim:hdim + zs_dim]], axis=1)
    wzs = jnp.concatenate([w1[hdim + zs_dim:], w4[hdim + zs_dim:]], axis=1)

    # Lane-dense padded output weights: q1 -> column 0, q2 -> column 1.
    w3p1 = jnp.zeros((hdim, OUT_PAD), jnp.float32).at[:, 0:1].set(w3)
    w3p2 = jnp.zeros((hdim, OUT_PAD), jnp.float32).at[:, 1:2].set(w6)
    b3p = jnp.zeros((1, OUT_PAD), jnp.float32).at[:, 0:1].set(b3).at[:, 1:2].set(b6)

    fused = {
        "w0s": w0[:state_dim].astype(bf16), "w0a": w0[state_dim:].astype(bf16), "b0": b0,
        "wzsa": wzsa.astype(bf16), "wzs": wzs.astype(bf16),
        "w1h1": w1[:hdim].astype(bf16), "b11": b1,
        "w1h2": w4[:hdim].astype(bf16), "b12": b4,
        "w21": w2.astype(bf16), "b21": b2,
        "w22": w5.astype(bf16), "b22": b5,
        "w3p1": w3p1.astype(bf16), "w3p2": w3p2.astype(bf16), "b3p": b3p,
    }
    return raw, fused


# ---------------------------------------------------------------------------
# Pure-JAX reference mirroring the PyTorch module exactly (f32, exact division).
# ---------------------------------------------------------------------------

def _avg_l1_norm_ref(x, eps=1e-8):
    return x / jnp.maximum(jnp.mean(jnp.abs(x), axis=-1, keepdims=True), eps)


def reference_forward(state, action, zsa, zs, raw):
    sa = jnp.concatenate([state, action], axis=1)
    emb = jnp.concatenate([zsa, zs], axis=1)

    def head(w0, b0, w1, b1, w2, b2, w3, b3):
        h = _avg_l1_norm_ref(sa @ w0 + b0)
        h = _elu(jnp.concatenate([h, emb], axis=1) @ w1 + b1)
        h = _elu(h @ w2 + b2)
        return h @ w3 + b3

    q1 = head(raw["w01"], raw["b01"], raw["w1"], raw["b1"],
              raw["w2"], raw["b2"], raw["w3"], raw["b3"])
    q2 = head(raw["w02"], raw["b02"], raw["w4"], raw["b4"],
              raw["w5"], raw["b5"], raw["w6"], raw["b6"])
    return jnp.concatenate([q1, q2], axis=1)


if __name__ == "__main__":
    B = 8
    state_dim, action_dim = 16, 8
    zs_dim, hdim = 32, 128   # hdim multiple of 128 -> lane-aligned head split

    key = jax.random.PRNGKey(0)
    k_s, k_a, k_zsa, k_zs, k_p = jax.random.split(key, 5)
    state = jax.random.normal(k_s, (B, state_dim), jnp.float32)
    action = jax.random.normal(k_a, (B, action_dim), jnp.float32)
    zsa = jax.random.normal(k_zsa, (B, zs_dim), jnp.float32)
    zs = jax.random.normal(k_zs, (B, zs_dim), jnp.float32)

    raw, fused = make_params(k_p, state_dim, action_dim, zs_dim, hdim)

    out = critic_forward(state, action, zsa, zs, fused, hdim=hdim)
    out = jax.block_until_ready(out)

    ref = reference_forward(state, action, zsa, zs, raw)
    assert out.shape == (B, 2)
    # tolerance covers bf16 MXU operands + approx-reciprocal AvgL1Norm (f32 accumulate)
    assert jnp.allclose(out, ref, atol=5e-2, rtol=5e-2), (out, ref)

    print("KERNEL_OK")
</pallas_src>

<mosaic_0001>
module attributes {stable_mosaic.version = 11 : i64} {
  func.func @_critic_kernel(%arg0: i32, %arg1: memref<8x16xf32, #tpu.memory_space<vmem>>, %arg2: memref<8x8xf32, #tpu.memory_space<vmem>>, %arg3: memref<8x32xf32, #tpu.memory_space<vmem>>, %arg4: memref<8x32xf32, #tpu.memory_space<vmem>>, %arg5: memref<16x256xbf16, #tpu.memory_space<vmem>>, %arg6: memref<8x256xbf16, #tpu.memory_space<vmem>>, %arg7: memref<1x256xf32, #tpu.memory_space<vmem>>, %arg8: memref<32x256xbf16, #tpu.memory_space<vmem>>, %arg9: memref<32x256xbf16, #tpu.memory_space<vmem>>, %arg10: memref<128x128xbf16, #tpu.memory_space<vmem>>, %arg11: memref<1x128xf32, #tpu.memory_space<vmem>>, %arg12: memref<128x128xbf16, #tpu.memory_space<vmem>>, %arg13: memref<1x128xf32, #tpu.memory_space<vmem>>, %arg14: memref<128x128xbf16, #tpu.memory_space<vmem>>, %arg15: memref<1x128xf32, #tpu.memory_space<vmem>>, %arg16: memref<128x128xbf16, #tpu.memory_space<vmem>>, %arg17: memref<1x128xf32, #tpu.memory_space<vmem>>, %arg18: memref<128x128xbf16, #tpu.memory_space<vmem>>, %arg19: memref<128x128xbf16, #tpu.memory_space<vmem>>, %arg20: memref<1x128xf32, #tpu.memory_space<vmem>>, %arg21: memref<8x128xf32, #tpu.memory_space<vmem>>) attributes {dimension_semantics = [#tpu.dimension_semantics<parallel>], iteration_bounds = array<i64: 1>, scalar_prefetch = 0 : i64, scratch_operands = 0 : i64, tpu.core_type = #tpu.core_type<tc>, window_params = [{transform_indices = @transform_0, window_bounds = array<i64: 8, 16>}, {transform_indices = @transform_1, window_bounds = array<i64: 8, 8>}, {transform_indices = @transform_2, window_bounds = array<i64: 8, 32>}, {transform_indices = @transform_3, window_bounds = array<i64: 8, 32>}, {pipeline_mode = #tpu.pipeline_mode<synchronous>, transform_indices = @transform_4, window_bounds = array<i64: 16, 256>}, {pipeline_mode = #tpu.pipeline_mode<synchronous>, transform_indices = @transform_5, window_bounds = array<i64: 8, 256>}, {pipeline_mode = #tpu.pipeline_mode<synchronous>, transform_indices = @transform_6, window_bounds = array<i64: 1, 256>}, {pipeline_mode = #tpu.pipeline_mode<synchronous>, transform_indices = @transform_7, window_bounds = array<i64: 32, 256>}, {pipeline_mode = #tpu.pipeline_mode<synchronous>, transform_indices = @transform_8, window_bounds = array<i64: 32, 256>}, {pipeline_mode = #tpu.pipeline_mode<synchronous>, transform_indices = @transform_9, window_bounds = array<i64: 128, 128>}, {pipeline_mode = #tpu.pipeline_mode<synchronous>, transform_indices = @transform_10, window_bounds = array<i64: 1, 128>}, {pipeline_mode = #tpu.pipeline_mode<synchronous>, transform_indices = @transform_11, window_bounds = array<i64: 128, 128>}, {pipeline_mode = #tpu.pipeline_mode<synchronous>, transform_indices = @transform_12, window_bounds = array<i64: 1, 128>}, {pipeline_mode = #tpu.pipeline_mode<synchronous>, transform_indices = @transform_13, window_bounds = array<i64: 128, 128>}, {pipeline_mode = #tpu.pipeline_mode<synchronous>, transform_indices = @transform_14, window_bounds = array<i64: 1, 128>}, {pipeline_mode = #tpu.pipeline_mode<synchronous>, transform_indices = @transform_15, window_bounds = array<i64: 128, 128>}, {pipeline_mode = #tpu.pipeline_mode<synchronous>, transform_indices = @transform_16, window_bounds = array<i64: 1, 128>}, {pipeline_mode = #tpu.pipeline_mode<synchronous>, transform_indices = @transform_17, window_bounds = array<i64: 128, 128>}, {pipeline_mode = #tpu.pipeline_mode<synchronous>, transform_indices = @transform_18, window_bounds = array<i64: 128, 128>}, {pipeline_mode = #tpu.pipeline_mode<synchronous>, transform_indices = @transform_19, window_bounds = array<i64: 1, 128>}, {transform_indices = @transform_20, window_bounds = array<i64: 8, 128>}]} {
    %c0 = arith.constant 0 : index
    %c0_0 = arith.constant 0 : index
    %0 = vector.load %arg1[%c0, %c0_0] : memref<8x16xf32, #tpu.memory_space<vmem>>, vector<8x16xf32>
    %1 = arith.truncf %0 : vector<8x16xf32> to vector<8x16xbf16>
    %c0_1 = arith.constant 0 : index
    %c0_2 = arith.constant 0 : index
    %2 = vector.load %arg5[%c0_1, %c0_2] : memref<16x256xbf16, #tpu.memory_space<vmem>>, vector<16x256xbf16>
    %cst = arith.constant dense<0.000000e+00> : vector<8x256xf32>
    %3 = tpu.matmul %1, %2, %cst {dimension_numbers = #tpu.dot_dimension_numbers<[1], [0], [0], [1], [0, 0, 1, 1], [], []>} : vector<8x16xbf16>, vector<16x256xbf16>, vector<8x256xf32> -> vector<8x256xf32>
    %c0_3 = arith.constant 0 : index
    %c0_4 = arith.constant 0 : index
    %4 = vector.load %arg2[%c0_3, %c0_4] : memref<8x8xf32, #tpu.memory_space<vmem>>, vector<8x8xf32>
    %5 = arith.truncf %4 : vector<8x8xf32> to vector<8x8xbf16>
    %c0_5 = arith.constant 0 : index
    %c0_6 = arith.constant 0 : index
    %6 = vector.load %arg6[%c0_5, %c0_6] : memref<8x256xbf16, #tpu.memory_space<vmem>>, vector<8x256xbf16>
    %cst_7 = arith.constant dense<0.000000e+00> : vector<8x256xf32>
    %7 = tpu.matmul %5, %6, %cst_7 {dimension_numbers = #tpu.dot_dimension_numbers<[1], [0], [0], [1], [0, 0, 1, 1], [], []>} : vector<8x8xbf16>, vector<8x256xbf16>, vector<8x256xf32> -> vector<8x256xf32>
    %8 = arith.addf %3, %7 : vector<8x256xf32>
    %c0_8 = arith.constant 0 : index
    %c0_9 = arith.constant 0 : index
    %9 = vector.load %arg7[%c0_8, %c0_9] : memref<1x256xf32, #tpu.memory_space<vmem>>, vector<1x256xf32>
    %10 = vector.broadcast %9 : vector<1x256xf32> to vector<8x256xf32>
    %11 = arith.addf %8, %10 : vector<8x256xf32>
    %c0_10 = arith.constant 0 : index
    %c0_11 = arith.constant 0 : index
    %12 = vector.load %arg3[%c0_10, %c0_11] : memref<8x32xf32, #tpu.memory_space<vmem>>, vector<8x32xf32>
    %13 = arith.truncf %12 : vector<8x32xf32> to vector<8x32xbf16>
    %c0_12 = arith.constant 0 : index
    %c0_13 = arith.constant 0 : index
    %14 = vector.load %arg8[%c0_12, %c0_13] : memref<32x256xbf16, #tpu.memory_space<vmem>>, vector<32x256xbf16>
    %cst_14 = arith.constant dense<0.000000e+00> : vector<8x256xf32>
    %15 = tpu.matmul %13, %14, %cst_14 {dimension_numbers = #tpu.dot_dimension_numbers<[1], [0], [0], [1], [0, 0, 1, 1], [], []>} : vector<8x32xbf16>, vector<32x256xbf16>, vector<8x256xf32> -> vector<8x256xf32>
    %c0_15 = arith.constant 0 : index
    %c0_16 = arith.constant 0 : index
    %16 = vector.load %arg4[%c0_15, %c0_16] : memref<8x32xf32, #tpu.memory_space<vmem>>, vector<8x32xf32>
    %17 = arith.truncf %16 : vector<8x32xf32> to vector<8x32xbf16>
    %c0_17 = arith.constant 0 : index
    %c0_18 = arith.constant 0 : index
    %18 = vector.load %arg9[%c0_17, %c0_18] : memref<32x256xbf16, #tpu.memory_space<vmem>>, vector<32x256xbf16>
    %cst_19 = arith.constant dense<0.000000e+00> : vector<8x256xf32>
    %19 = tpu.matmul %17, %18, %cst_19 {dimension_numbers = #tpu.dot_dimension_numbers<[1], [0], [0], [1], [0, 0, 1, 1], [], []>} : vector<8x32xbf16>, vector<32x256xbf16>, vector<8x256xf32> -> vector<8x256xf32>
    %20 = arith.addf %15, %19 : vector<8x256xf32>
    %21 = vector.extract_strided_slice %11 {offsets = [0, 0], sizes = [8, 128], strides = [1, 1]} : vector<8x256xf32> to vector<8x128xf32>
    %22 = vector.extract_strided_slice %20 {offsets = [0, 0], sizes = [8, 128], strides = [1, 1]} : vector<8x256xf32> to vector<8x128xf32>
    %23 = math.absf %21 : vector<8x128xf32>
    %cst_20 = arith.constant dense<0.000000e+00> : vector<8xf32>
    %24 = vector.multi_reduction <add>, %23, %cst_20 [1] : vector<8x128xf32> to vector<8xf32>
    %25 = vector.shape_cast %24 : vector<8xf32> to vector<8x1xf32>
    %cst_21 = arith.constant 1.280000e+02 : f32
    %26 = vector.broadcast %cst_21 : f32 to vector<8x1xf32>
    %27 = arith.divf %25, %26 : vector<8x1xf32>
    %cst_22 = arith.constant 9.99999993E-9 : f32
    %28 = vector.broadcast %cst_22 : f32 to vector<8x1xf32>
    %29 = arith.maximumf %27, %28 : vector<8x1xf32>
    %30 = tpu.reciprocal %29 {approx = true} : vector<8x1xf32> -> vector<8x1xf32>
    %31 = vector.broadcast %30 : vector<8x1xf32> to vector<8x128xf32>
    %32 = arith.mulf %21, %31 : vector<8x128xf32>
    %33 = arith.truncf %32 : vector<8x128xf32> to vector<8x128xbf16>
    %c0_23 = arith.constant 0 : index
    %c0_24 = arith.constant 0 : index
    %34 = vector.load %arg10[%c0_23, %c0_24] : memref<128x128xbf16, #tpu.memory_space<vmem>>, vector<128x128xbf16>
    %cst_25 = arith.constant dense<0.000000e+00> : vector<8x128xf32>
    %35 = tpu.matmul %33, %34, %cst_25 {dimension_numbers = #tpu.dot_dimension_numbers<[1], [0], [0], [1], [0, 0, 1, 1], [], []>} : vector<8x128xbf16>, vector<128x128xbf16>, vector<8x128xf32> -> vector<8x128xf32>
    %36 = arith.addf %35, %22 : vector<8x128xf32>
    %c0_26 = arith.constant 0 : index
    %c0_27 = arith.constant 0 : index
    %37 = vector.load %arg11[%c0_26, %c0_27] : memref<1x128xf32, #tpu.memory_space<vmem>>, vector<1x128xf32>
    %38 = vector.broadcast %37 : vector<1x128xf32> to vector<8x128xf32>
    %39 = arith.addf %36, %38 : vector<8x128xf32>
    %cst_28 = arith.constant 0.000000e+00 : f32
    %40 = vector.broadcast %cst_28 : f32 to vector<8x128xf32>
    %41 = arith.cmpf ogt, %39, %40 : vector<8x128xf32>
    %cst_29 = arith.constant 0.000000e+00 : f32
    %42 = vector.broadcast %cst_29 : f32 to vector<8x128xf32>
    %43 = arith.minimumf %39, %42 : vector<8x128xf32>
    %44 = math.exp %43 : vector<8x128xf32>
    %cst_30 = arith.constant 1.000000e+00 : f32
    %45 = vector.broadcast %cst_30 : f32 to vector<8x128xf32>
    %46 = arith.subf %44, %45 : vector<8x128xf32>
    %47 = arith.select %41, %39, %46 : vector<8x128xi1>, vector<8x128xf32>
    %48 = arith.truncf %47 : vector<8x128xf32> to vector<8x128xbf16>
    %c0_31 = arith.constant 0 : index
    %c0_32 = arith.constant 0 : index
    %49 = vector.load %arg14[%c0_31, %c0_32] : memref<128x128xbf16, #tpu.memory_space<vmem>>, vector<128x128xbf16>
    %cst_33 = arith.constant dense<0.000000e+00> : vector<8x128xf32>
    %50 = tpu.matmul %48, %49, %cst_33 {dimension_numbers = #tpu.dot_dimension_numbers<[1], [0], [0], [1], [0, 0, 1, 1], [], []>} : vector<8x128xbf16>, vector<128x128xbf16>, vector<8x128xf32> -> vector<8x128xf32>
    %c0_34 = arith.constant 0 : index
    %c0_35 = arith.constant 0 : index
    %51 = vector.load %arg15[%c0_34, %c0_35] : memref<1x128xf32, #tpu.memory_space<vmem>>, vector<1x128xf32>
    %52 = vector.broadcast %51 : vector<1x128xf32> to vector<8x128xf32>
    %53 = arith.addf %50, %52 : vector<8x128xf32>
    %cst_36 = arith.constant 0.000000e+00 : f32
    %54 = vector.broadcast %cst_36 : f32 to vector<8x128xf32>
    %55 = arith.cmpf ogt, %53, %54 : vector<8x128xf32>
    %cst_37 = arith.constant 0.000000e+00 : f32
    %56 = vector.broadcast %cst_37 : f32 to vector<8x128xf32>
    %57 = arith.minimumf %53, %56 : vector<8x128xf32>
    %58 = math.exp %57 : vector<8x128xf32>
    %cst_38 = arith.constant 1.000000e+00 : f32
    %59 = vector.broadcast %cst_38 : f32 to vector<8x128xf32>
    %60 = arith.subf %58, %59 : vector<8x128xf32>
    %61 = arith.select %55, %53, %60 : vector<8x128xi1>, vector<8x128xf32>
    %62 = arith.truncf %61 : vector<8x128xf32> to vector<8x128xbf16>
    %c0_39 = arith.constant 0 : index
    %c0_40 = arith.constant 0 : index
    %63 = vector.load %arg18[%c0_39, %c0_40] : memref<128x128xbf16, #tpu.memory_space<vmem>>, vector<128x128xbf16>
    %cst_41 = arith.constant dense<0.000000e+00> : vector<8x128xf32>
    %64 = tpu.matmul %62, %63, %cst_41 {dimension_numbers = #tpu.dot_dimension_numbers<[1], [0], [0], [1], [0, 0, 1, 1], [], []>} : vector<8x128xbf16>, vector<128x128xbf16>, vector<8x128xf32> -> vector<8x128xf32>
    %65 = vector.extract_strided_slice %11 {offsets = [0, 128], sizes = [8, 128], strides = [1, 1]} : vector<8x256xf32> to vector<8x128xf32>
    %66 = vector.extract_strided_slice %20 {offsets = [0, 128], sizes = [8, 128], strides = [1, 1]} : vector<8x256xf32> to vector<8x128xf32>
    %67 = math.absf %65 : vector<8x128xf32>
    %cst_42 = arith.constant dense<0.000000e+00> : vector<8xf32>
    %68 = vector.multi_reduction <add>, %67, %cst_42 [1] : vector<8x128xf32> to vector<8xf32>
    %69 = vector.shape_cast %68 : vector<8xf32> to vector<8x1xf32>
    %cst_43 = arith.constant 1.280000e+02 : f32
    %70 = vector.broadcast %cst_43 : f32 to vector<8x1xf32>
    %71 = arith.divf %69, %70 : vector<8x1xf32>
    %cst_44 = arith.constant 9.99999993E-9 : f32
    %72 = vector.broadcast %cst_44 : f32 to vector<8x1xf32>
    %73 = arith.maximumf %71, %72 : vector<8x1xf32>
    %74 = tpu.reciprocal %73 {approx = true} : vector<8x1xf32> -> vector<8x1xf32>
    %75 = vector.broadcast %74 : vector<8x1xf32> to vector<8x128xf32>
    %76 = arith.mulf %65, %75 : vector<8x128xf32>
    %77 = arith.truncf %76 : vector<8x128xf32> to vector<8x128xbf16>
    %c0_45 = arith.constant 0 : index
    %c0_46 = arith.constant 0 : index
    %78 = vector.load %arg12[%c0_45, %c0_46] : memref<128x128xbf16, #tpu.memory_space<vmem>>, vector<128x128xbf16>
    %cst_47 = arith.constant dense<0.000000e+00> : vector<8x128xf32>
    %79 = tpu.matmul %77, %78, %cst_47 {dimension_numbers = #tpu.dot_dimension_numbers<[1], [0], [0], [1], [0, 0, 1, 1], [], []>} : vector<8x128xbf16>, vector<128x128xbf16>, vector<8x128xf32> -> vector<8x128xf32>
    %80 = arith.addf %79, %66 : vector<8x128xf32>
    %c0_48 = arith.constant 0 : index
    %c0_49 = arith.constant 0 : index
    %81 = vector.load %arg13[%c0_48, %c0_49] : memref<1x128xf32, #tpu.memory_space<vmem>>, vector<1x128xf32>
    %82 = vector.broadcast %81 : vector<1x128xf32> to vector<8x128xf32>
    %83 = arith.addf %80, %82 : vector<8x128xf32>
    %cst_50 = arith.constant 0.000000e+00 : f32
    %84 = vector.broadcast %cst_50 : f32 to vector<8x128xf32>
    %85 = arith.cmpf ogt, %83, %84 : vector<8x128xf32>
    %cst_51 = arith.constant 0.000000e+00 : f32
    %86 = vector.broadcast %cst_51 : f32 to vector<8x128xf32>
    %87 = arith.minimumf %83, %86 : vector<8x128xf32>
    %88 = math.exp %87 : vector<8x128xf32>
    %cst_52 = arith.constant 1.000000e+00 : f32
    %89 = vector.broadcast %cst_52 : f32 to vector<8x128xf32>
    %90 = arith.subf %88, %89 : vector<8x128xf32>
    %91 = arith.select %85, %83, %90 : vector<8x128xi1>, vector<8x128xf32>
    %92 = arith.truncf %91 : vector<8x128xf32> to vector<8x128xbf16>
    %c0_53 = arith.constant 0 : index
    %c0_54 = arith.constant 0 : index
    %93 = vector.load %arg16[%c0_53, %c0_54] : memref<128x128xbf16, #tpu.memory_space<vmem>>, vector<128x128xbf16>
    %cst_55 = arith.constant dense<0.000000e+00> : vector<8x128xf32>
    %94 = tpu.matmul %92, %93, %cst_55 {dimension_numbers = #tpu.dot_dimension_numbers<[1], [0], [0], [1], [0, 0, 1, 1], [], []>} : vector<8x128xbf16>, vector<128x128xbf16>, vector<8x128xf32> -> vector<8x128xf32>
    %c0_56 = arith.constant 0 : index
    %c0_57 = arith.constant 0 : index
    %95 = vector.load %arg17[%c0_56, %c0_57] : memref<1x128xf32, #tpu.memory_space<vmem>>, vector<1x128xf32>
    %96 = vector.broadcast %95 : vector<1x128xf32> to vector<8x128xf32>
    %97 = arith.addf %94, %96 : vector<8x128xf32>
    %cst_58 = arith.constant 0.000000e+00 : f32
    %98 = vector.broadcast %cst_58 : f32 to vector<8x128xf32>
    %99 = arith.cmpf ogt, %97, %98 : vector<8x128xf32>
    %cst_59 = arith.constant 0.000000e+00 : f32
    %100 = vector.broadcast %cst_59 : f32 to vector<8x128xf32>
    %101 = arith.minimumf %97, %100 : vector<8x128xf32>
    %102 = math.exp %101 : vector<8x128xf32>
    %cst_60 = arith.constant 1.000000e+00 : f32
    %103 = vector.broadcast %cst_60 : f32 to vector<8x128xf32>
    %104 = arith.subf %102, %103 : vector<8x128xf32>
    %105 = arith.select %99, %97, %104 : vector<8x128xi1>, vector<8x128xf32>
    %106 = arith.truncf %105 : vector<8x128xf32> to vector<8x128xbf16>
    %c0_61 = arith.constant 0 : index
    %c0_62 = arith.constant 0 : index
    %107 = vector.load %arg19[%c0_61, %c0_62] : memref<128x128xbf16, #tpu.memory_space<vmem>>, vector<128x128xbf16>
    %cst_63 = arith.constant dense<0.000000e+00> : vector<8x128xf32>
    %108 = tpu.matmul %106, %107, %cst_63 {dimension_numbers = #tpu.dot_dimension_numbers<[1], [0], [0], [1], [0, 0, 1, 1], [], []>} : vector<8x128xbf16>, vector<128x128xbf16>, vector<8x128xf32> -> vector<8x128xf32>
    %109 = arith.addf %64, %108 : vector<8x128xf32>
    %c0_64 = arith.constant 0 : index
    %c0_65 = arith.constant 0 : index
    %110 = vector.load %arg20[%c0_64, %c0_65] : memref<1x128xf32, #tpu.memory_space<vmem>>, vector<1x128xf32>
    %111 = vector.broadcast %110 : vector<1x128xf32> to vector<8x128xf32>
    %112 = arith.addf %109, %111 : vector<8x128xf32>
    %c0_66 = arith.constant 0 : index
    %c0_67 = arith.constant 0 : index
    %113 = vector.load %arg21[%c0_66, %c0_67] : memref<8x128xf32, #tpu.memory_space<vmem>>, vector<8x128xf32>
    tpu.vector_store %arg21[%c0_66, %c0_67], %112 {strides = array<i32>} : memref<8x128xf32, #tpu.memory_space<vmem>>, vector<8x128xf32>,
    return
  }
  func.func @transform_0(%arg0: i32) -> (i32, i32) {
    %c0_i32 = arith.constant 0 : i32
    %c0_i32_0 = arith.constant 0 : i32
    return %arg0, %c0_i32 : i32, i32
  }
  func.func @transform_1(%arg0: i32) -> (i32, i32) {
    %c0_i32 = arith.constant 0 : i32
    %c0_i32_0 = arith.constant 0 : i32
    return %arg0, %c0_i32 : i32, i32
  }
  func.func @transform_2(%arg0: i32) -> (i32, i32) {
    %c0_i32 = arith.constant 0 : i32
    %c0_i32_0 = arith.constant 0 : i32
    return %arg0, %c0_i32 : i32, i32
  }
  func.func @transform_3(%arg0: i32) -> (i32, i32) {
    %c0_i32 = arith.constant 0 : i32
    %c0_i32_0 = arith.constant 0 : i32
    return %arg0, %c0_i32 : i32, i32
  }
  func.func @transform_4(%arg0: i32) -> (i32, i32) {
    %c0_i32 = arith.constant 0 : i32
    %c0_i32_0 = arith.constant 0 : i32
    %c0_i32_1 = arith.constant 0 : i32
    return %c0_i32, %c0_i32_0 : i32, i32
  }
  func.func @transform_5(%arg0: i32) -> (i32, i32) {
    %c0_i32 = arith.constant 0 : i32
    %c0_i32_0 = arith.constant 0 : i32
    %c0_i32_1 = arith.constant 0 : i32
    return %c0_i32, %c0_i32_0 : i32, i32
  }
  func.func @transform_6(%arg0: i32) -> (i32, i32) {
    %c0_i32 = arith.constant 0 : i32
    %c0_i32_0 = arith.constant 0 : i32
    %c0_i32_1 = arith.constant 0 : i32
    return %c0_i32, %c0_i32_0 : i32, i32
  }
  func.func @transform_7(%arg0: i32) -> (i32, i32) {
    %c0_i32 = arith.constant 0 : i32
    %c0_i32_0 = arith.constant 0 : i32
    %c0_i32_1 = arith.constant 0 : i32
    return %c0_i32, %c0_i32_0 : i32, i32
  }
  func.func @transform_8(%arg0: i32) -> (i32, i32) {
    %c0_i32 = arith.constant 0 : i32
    %c0_i32_0 = arith.constant 0 : i32
    %c0_i32_1 = arith.constant 0 : i32
    return %c0_i32, %c0_i32_0 : i32, i32
  }
  func.func @transform_9(%arg0: i32) -> (i32, i32) {
    %c0_i32 = arith.constant 0 : i32
    %c0_i32_0 = arith.constant 0 : i32
    %c0_i32_1 = arith.constant 0 : i32
    return %c0_i32, %c0_i32_0 : i32, i32
  }
  func.func @transform_10(%arg0: i32) -> (i32, i32) {
    %c0_i32 = arith.constant 0 : i32
    %c0_i32_0 = arith.constant 0 : i32
    %c0_i32_1 = arith.constant 0 : i32
    return %c0_i32, %c0_i32_0 : i32, i32
  }
  func.func @transform_11(%arg0: i32) -> (i32, i32) {
    %c0_i32 = arith.constant 0 : i32
    %c0_i32_0 = arith.constant 0 : i32
    %c0_i32_1 = arith.constant 0 : i32
    return %c0_i32, %c0_i32_0 : i32, i32
  }
  func.func @transform_12(%arg0: i32) -> (i32, i32) {
    %c0_i32 = arith.constant 0 : i32
    %c0_i32_0 = arith.constant 0 : i32
    %c0_i32_1 = arith.constant 0 : i32
    return %c0_i32, %c0_i32_0 : i32, i32
  }
  func.func @transform_13(%arg0: i32) -> (i32, i32) {
    %c0_i32 = arith.constant 0 : i32
    %c0_i32_0 = arith.constant 0 : i32
    %c0_i32_1 = arith.constant 0 : i32
    return %c0_i32, %c0_i32_0 : i32, i32
  }
  func.func @transform_14(%arg0: i32) -> (i32, i32) {
    %c0_i32 = arith.constant 0 : i32
    %c0_i32_0 = arith.constant 0 : i32
    %c0_i32_1 = arith.constant 0 : i32
    return %c0_i32, %c0_i32_0 : i32, i32
  }
  func.func @transform_15(%arg0: i32) -> (i32, i32) {
    %c0_i32 = arith.constant 0 : i32
    %c0_i32_0 = arith.constant 0 : i32
    %c0_i32_1 = arith.constant 0 : i32
    return %c0_i32, %c0_i32_0 : i32, i32
  }
  func.func @transform_16(%arg0: i32) -> (i32, i32) {
    %c0_i32 = arith.constant 0 : i32
    %c0_i32_0 = arith.constant 0 : i32
    %c0_i32_1 = arith.constant 0 : i32
    return %c0_i32, %c0_i32_0 : i32, i32
  }
  func.func @transform_17(%arg0: i32) -> (i32, i32) {
    %c0_i32 = arith.constant 0 : i32
    %c0_i32_0 = arith.constant 0 : i32
    %c0_i32_1 = arith.constant 0 : i32
    return %c0_i32, %c0_i32_0 : i32, i32
  }
  func.func @transform_18(%arg0: i32) -> (i32, i32) {
    %c0_i32 = arith.constant 0 : i32
    %c0_i32_0 = arith.constant 0 : i32
    %c0_i32_1 = arith.constant 0 : i32
    return %c0_i32, %c0_i32_0 : i32, i32
  }
  func.func @transform_19(%arg0: i32) -> (i32, i32) {
    %c0_i32 = arith.constant 0 : i32
    %c0_i32_0 = arith.constant 0 : i32
    %c0_i32_1 = arith.constant 0 : i32
    return %c0_i32, %c0_i32_0 : i32, i32
  }
  func.func @transform_20(%arg0: i32) -> (i32, i32) {
    %c0_i32 = arith.constant 0 : i32
    %c0_i32_0 = arith.constant 0 : i32
    return %arg0, %c0_i32 : i32, i32
  }
}

</mosaic_0001>

<bundles_post_ra>
// kernel: tpu_custom_call.1
= control target key start
LH: loop header
LB: loop body
LE: loop exit
PB: predicated region body
PF: predicated region fallthrough
CT: control target
= control target key end

     0   :  { %s2568_s0 = inlined_call_operand.hbm [shape: f32[8,16], index: 0, kind: input, shape index: {}]   ;;  %s2569_s1 = inlined_call_operand.hbm [shape: f32[8,8], index: 1, kind: input, shape index: {}]   ;;  %s2570_s2 = inlined_call_operand.hbm [shape: f32[8,32], index: 2, kind: input, shape index: {}]   ;;  %s2571_s3 = inlined_call_operand.hbm [shape: f32[8,32], index: 3, kind: input, shape index: {}]   ;;  %s2572_s4 = inlined_call_operand.hbm [shape: bf16[16,256], index: 4, kind: input, shape index: {}]   ;;  %s2573_s5 = inlined_call_operand.hbm [shape: bf16[8,256], index: 5, kind: input, shape index: {}]   ;;  %s2574_s6 = inlined_call_operand.hbm [shape: f32[1,256], index: 6, kind: input, shape index: {}]   ;;  %s2575_s7 = inlined_call_operand.hbm [shape: bf16[32,256], index: 7, kind: input, shape index: {}]   ;;  %s2576_s8 = inlined_call_operand.hbm [shape: bf16[32,256], index: 8, kind: input, shape index: {}]   ;;  %s2577_s9 = inlined_call_operand.hbm [shape: bf16[128,128], index: 9, kind: input, shape index: {}]   ;;  %s2578_s10 = inlined_call_operand.hbm [shape: f32[1,128], index: 10, kind: input, shape index: {}]   ;;  %s2579_s11 = inlined_call_operand.hbm [shape: bf16[128,128], index: 11, kind: input, shape index: {}]   ;;  %s2580_s12 = inlined_call_operand.hbm [shape: f32[1,128], index: 12, kind: input, shape index: {}]   ;;  %s2581_s13 = inlined_call_operand.hbm [shape: bf16[128,128], index: 13, kind: input, shape index: {}]   ;;  %s2582_s14 = inlined_call_operand.hbm [shape: f32[1,128], index: 14, kind: input, shape index: {}]   ;;  %s2583_s15 = inlined_call_operand.hbm [shape: bf16[128,128], index: 15, kind: input, shape index: {}]   ;;  %s2584_s16 = inlined_call_operand.hbm [shape: f32[1,128], index: 16, kind: input, shape index: {}]   ;;  %s2585_s17 = inlined_call_operand.vmem [shape: bf16[128,128], index: 17, kind: input, shape index: {}]   ;;  %s2586_s18 = inlined_call_operand.hbm [shape: bf16[128,128], index: 18, kind: input, shape index: {}]   ;;  %s2587_s19 = inlined_call_operand.vmem [shape: f32[1,128], index: 19, kind: input, shape index: {}]   ;;  %s2588_s20 = inlined_call_operand.hbm [shape: f32[8,128], index: 20, kind: output, shape index: {}]  }
   0x1   :  { %2596 = sst [smem:[#allocation43_spill]] %s2568_s0 }
   0x2   :  { %2597 = sst [smem:[#allocation44_spill]] %s2569_s1 }
   0x3   :  { %2598 = sst [smem:[#allocation45_spill]] %s2570_s2 }
   0x4   :  { %2599 = sst [smem:[#allocation46_spill]] %s2571_s3 }
   0x5   :  { %2600 = sst [smem:[#allocation47_spill]] %s2572_s4 }
   0x6   :  { %25 = vsyncpa [#allocation3], 0 }
   0x7   :  { %26 = vsyncpa [#allocation6], 0 }
   0x8   :  { %27 = vsyncpa [#allocation9], 0 }
   0x9   :  { %28 = vsyncpa [#allocation12], 0 }
   0xa   :  { %29 = vsyncpa [#allocation15], 0 }
   0xb   :  { %30 = vsyncpa [#allocation18], 0 }
   0xc   :  { %31 = vsyncpa [#allocation21], 0 }
   0xd   :  { %32 = vsyncpa [#allocation24], 0 }
   0xe   :  { %33 = vsyncpa [#allocation27], 0 }
   0xf   :  { %34 = vsyncpa [#allocation30], 0 }
  0x10   :  { %35 = vsyncpa [#allocation4], 0  ;;  %s2088_s1 = smov [#allocation5]   ;;  %s2089_s23 = smov [#allocation8]  }
  0x11   :  { %s52_s22 = sshll.u32 %s2088_s1, 4  ;;  %s72_s24 = sshll.u32 %s2089_s23, 4  ;;  %s53_s22 = int_to_ptr.vmem [resolvable:$true] %s52_s22  ;;  %s73_s24 = int_to_ptr.vmem [resolvable:$true] %s72_s24 }
  0x12   :  { %s2601_s3 = sld [smem:[#allocation44_spill]] }
  0x18   :  { %s1648_s26 = scalar_lea.hbm %s2601_s3, 128 }
  0x19   :  { %p1649_p0 = scmp.ne.s32.totalorder %s2601_s3, %s1648_s26  ;;  %p1652_p1 = scmp.lt.u32.totalorder %s1648_s26, %s2601_s3 }
  0x1b   :  { %p1654_p2 = pnand %p1652_p1, %p1649_p0 }
  0x1d   :  { %1657 = shalt.err (!%p1654_p2)
}
  0x1e   :  { %s1658_s30 = scalar_lea.vmem %s53_s22, 128  ;;  %p1663_p4 = scmp.lt.s32.totalorder %s53_s22, %s53_s22 }
  0x1f   :  { %p1659_p3 = scmp.ne.s32.totalorder %s53_s22, %s1658_s30  ;;  %p1664_p5 = scmp.lt.s32.totalorder %s1658_s30, %s1658_s30 }
  0x21   :  { %p1665_p6 = por %p1664_p5, %p1663_p4 }
  0x23   :  { %p1666_p7 = pnand %p1665_p6, %p1659_p3 }
  0x25   :  { %1669 = shalt.err (!%p1666_p7)
}
  0x26   :  { %55 = dma.hbm_to_vmem [thread:$0]  %s2601_s3, 128, %s53_s22, [#allocation6]  }
  0x27   :  { %s2602_s2 = sld [smem:[#allocation46_spill]] }
  0x2d   :  { %s1670_s25 = scalar_lea.hbm %s2602_s2, 128 }
  0x2e   :  { %p1671_p8 = scmp.ne.s32.totalorder %s2602_s2, %s1670_s25  ;;  %p1674_p9 = scmp.lt.u32.totalorder %s1670_s25, %s2602_s2 }
  0x30   :  { %p1676_p10 = pnand %p1674_p9, %p1671_p8 }
  0x32   :  { %1679 = shalt.err (!%p1676_p10)
}
  0x33   :  { %s1680_s29 = scalar_lea.vmem %s73_s24, 128  ;;  %p1685_p12 = scmp.lt.s32.totalorder %s73_s24, %s73_s24 }
  0x34   :  { %p1681_p11 = scmp.ne.s32.totalorder %s73_s24, %s1680_s29  ;;  %p1686_p13 = scmp.lt.s32.totalorder %s1680_s29, %s1680_s29 }
  0x36   :  { %p1687_p0 = por %p1686_p13, %p1685_p12 }
  0x38   :  { %p1688_p1 = pnand %p1687_p0, %p1681_p11 }
  0x3a   :  { %1691 = shalt.err (!%p1688_p1)
}
  0x3b   :  { %75 = dma.hbm_to_vmem [thread:$0]  %s2602_s2, 128, %s73_s24, [#allocation9]  }
  0x3c   :  { %s2090_s30 = smov [#allocation11]   ;;  %s1692_s23 = scalar_lea.hbm %s2573_s5, 128 }
  0x3d   :  { %s94_s0 = sshll.u32 %s2090_s30, 4  ;;  %p1693_p2 = scmp.ne.s32.totalorder %s2573_s5, %s1692_s23  ;;  %s95_s0 = int_to_ptr.vmem [resolvable:$true] %s94_s0 }
  0x3e   :  { %p1696_p3 = scmp.lt.u32.totalorder %s1692_s23, %s2573_s5 }
  0x40   :  { %p1698_p4 = pnand %p1696_p3, %p1693_p2 }
  0x42   :  { %1701 = shalt.err (!%p1698_p4)
}
  0x43   :  { %s1702_s4 = scalar_lea.vmem %s95_s0, 128  ;;  %p1707_p6 = scmp.lt.s32.totalorder %s95_s0, %s95_s0 }
  0x44   :  { %p1703_p5 = scmp.ne.s32.totalorder %s95_s0, %s1702_s4  ;;  %p1708_p7 = scmp.lt.s32.totalorder %s1702_s4, %s1702_s4 }
  0x46   :  { %p1709_p8 = por %p1708_p7, %p1707_p6 }
  0x48   :  { %p1710_p9 = pnand %p1709_p8, %p1703_p5 }
  0x4a   :  { %1713 = shalt.err (!%p1710_p9)
}
  0x4b   :  { %97 = dma.hbm_to_vmem [thread:$0]  %s2573_s5, 128, %s95_s0, [#allocation12]  }
  0x4c   :  { %s2091_s29 = smov [#allocation14]   ;;  %s2092_s3 = smov [#allocation17]  }
  0x4d   :  { %s113_s22 = sshll.u32 %s2091_s29, 4  ;;  %s137_s30 = sshll.u32 %s2092_s3, 4  ;;  %s114_s22 = int_to_ptr.vmem [resolvable:$true] %s113_s22  ;;  %s138_s30 = int_to_ptr.vmem [resolvable:$true] %s137_s30 }
  0x4e   :  { %s1714_s23 = scalar_lea.hbm %s2575_s7, 512 }
  0x4f   :  { %p1715_p10 = scmp.ne.s32.totalorder %s2575_s7, %s1714_s23  ;;  %p1718_p11 = scmp.lt.u32.totalorder %s1714_s23, %s2575_s7 }
  0x51   :  { %p1720_p12 = pnand %p1718_p11, %p1715_p10 }
  0x53   :  { %1723 = shalt.err (!%p1720_p12)
}
  0x54   :  { %s1724_s5 = scalar_lea.vmem %s114_s22, 512  ;;  %p1729_p0 = scmp.lt.s32.totalorder %s114_s22, %s114_s22 }
  0x55   :  { %p1725_p13 = scmp.ne.s32.totalorder %s114_s22, %s1724_s5  ;;  %p1730_p1 = scmp.lt.s32.totalorder %s1724_s5, %s1724_s5 }
  0x57   :  { %p1731_p2 = por %p1730_p1, %p1729_p0 }
  0x59   :  { %p1732_p3 = pnand %p1731_p2, %p1725_p13 }
  0x5b   :  { %1735 = shalt.err (!%p1732_p3)
}
  0x5c   :  { %s2594_s0 = smov 128   ;;  %s2094_s4 = smov 8  }
  0x5d   :  { %119 = dma.hbm_to_vmem [thread:$0]  %s2575_s7, 512, %s114_s22, [#allocation15], %s2594_s0, %s2594_s0, %s2094_s4  }
  0x5e   :  { %s1736_s21 = scalar_lea.hbm %s2577_s9, 1024 }
  0x5f   :  { %p1737_p4 = scmp.ne.s32.totalorder %s2577_s9, %s1736_s21  ;;  %p1740_p5 = scmp.lt.u32.totalorder %s1736_s21, %s2577_s9 }
  0x61   :  { %p1742_p6 = pnand %p1740_p5, %p1737_p4 }
  0x63   :  { %1745 = shalt.err (!%p1742_p6)
}
  0x64   :  { %s1746_s28 = scalar_lea.vmem %s138_s30, 1024  ;;  %p1751_p8 = scmp.lt.s32.totalorder %s138_s30, %s138_s30 }
  0x65   :  { %p1747_p7 = scmp.ne.s32.totalorder %s138_s30, %s1746_s28  ;;  %p1752_p9 = scmp.lt.s32.totalorder %s1746_s28, %s1746_s28 }
  0x67   :  { %p1753_p10 = por %p1752_p9, %p1751_p8 }
  0x69   :  { %p1754_p11 = pnand %p1753_p10, %p1747_p7 }
  0x6b   :  { %1757 = shalt.err (!%p1754_p11)
}
  0x6c   :  { %s2095_s7 = smov 64   ;;  %s2096_s22 = smov 4  }
  0x6d   :  { %143 = dma.hbm_to_vmem [thread:$0]  %s2577_s9, 1024, %s138_s30, [#allocation18], %s2095_s7, %s2095_s7, %s2096_s22  }
  0x6e   :  { %s2097_s24 = smov [#allocation20]   ;;  %s2098_s29 = smov [#allocation23]  }
  0x6f   :  { %s159_s2 = sshll.u32 %s2097_s24, 4  ;;  %s181_s3 = sshll.u32 %s2098_s29, 4  ;;  %s160_s2 = int_to_ptr.vmem [resolvable:$true] %s159_s2  ;;  %s182_s3 = int_to_ptr.vmem [resolvable:$true] %s181_s3 }
  0x70   :  { %s1758_s23 = scalar_lea.hbm %s2579_s11, 1024 }
  0x71   :  { %p1759_p12 = scmp.ne.s32.totalorder %s2579_s11, %s1758_s23  ;;  %p1762_p13 = scmp.lt.u32.totalorder %s1758_s23, %s2579_s11 }
  0x73   :  { %p1764_p0 = pnand %p1762_p13, %p1759_p12 }
  0x75   :  { %1767 = shalt.err (!%p1764_p0)
}
  0x76   :  { %s1768_s9 = scalar_lea.vmem %s160_s2, 1024  ;;  %p1773_p2 = scmp.lt.s32.totalorder %s160_s2, %s160_s2 }
  0x77   :  { %p1769_p1 = scmp.ne.s32.totalorder %s160_s2, %s1768_s9  ;;  %p1774_p3 = scmp.lt.s32.totalorder %s1768_s9, %s1768_s9 }
  0x79   :  { %p1775_p4 = por %p1774_p3, %p1773_p2 }
  0x7b   :  { %p1776_p5 = pnand %p1775_p4, %p1769_p1 }
  0x7d   :  { %1779 = shalt.err (!%p1776_p5)
}
  0x7e   :  { %165 = dma.hbm_to_vmem [thread:$0]  %s2579_s11, 1024, %s160_s2, [#allocation21], %s2095_s7, %s2095_s7, %s2096_s22  }
  0x7f   :  { %s1780_s24 = scalar_lea.hbm %s2581_s13, 1024 }
  0x80   :  { %p1781_p6 = scmp.ne.s32.totalorder %s2581_s13, %s1780_s24  ;;  %p1784_p7 = scmp.lt.u32.totalorder %s1780_s24, %s2581_s13 }
  0x82   :  { %p1786_p8 = pnand %p1784_p7, %p1781_p6 }
  0x84   :  { %1789 = shalt.err (!%p1786_p8)
}
  0x85   :  { %s1790_s25 = scalar_lea.vmem %s182_s3, 1024  ;;  %p1795_p10 = scmp.lt.s32.totalorder %s182_s3, %s182_s3 }
  0x86   :  { %p1791_p9 = scmp.ne.s32.totalorder %s182_s3, %s1790_s25  ;;  %p1796_p11 = scmp.lt.s32.totalorder %s1790_s25, %s1790_s25 }
  0x88   :  { %p1797_p12 = por %p1796_p11, %p1795_p10 }
  0x8a   :  { %p1798_p13 = pnand %p1797_p12, %p1791_p9 }
  0x8c   :  { %1801 = shalt.err (!%p1798_p13)
}
  0x8d   :  { %187 = dma.hbm_to_vmem [thread:$0]  %s2581_s13, 1024, %s182_s3, [#allocation24], %s2095_s7, %s2095_s7, %s2096_s22  }
  0x8e   :  { %s2099_s27 = smov [#allocation26]   ;;  %s2100_s9 = smov [#allocation2]  }
  0x8f   :  { %s203_s28 = sshll.u32 %s2099_s27, 4  ;;  %s42_s30 = sshll.u32 %s2100_s9, 4  ;;  %s204_s28 = int_to_ptr.vmem [resolvable:$true] %s203_s28  ;;  %s43_s30 = int_to_ptr.vmem [resolvable:$true] %s42_s30 }
  0x90   :  { %s1802_s0 = scalar_lea.hbm %s2583_s15, 1024 }
  0x91   :  { %p1803_p0 = scmp.ne.s32.totalorder %s2583_s15, %s1802_s0  ;;  %p1806_p1 = scmp.lt.u32.totalorder %s1802_s0, %s2583_s15 }
  0x93   :  { %p1808_p2 = pnand %p1806_p1, %p1803_p0 }
  0x95   :  { %1811 = shalt.err (!%p1808_p2)
}
  0x96   :  { %s1812_s13 = scalar_lea.vmem %s204_s28, 1024  ;;  %p1817_p4 = scmp.lt.s32.totalorder %s204_s28, %s204_s28 }
  0x97   :  { %p1813_p3 = scmp.ne.s32.totalorder %s204_s28, %s1812_s13  ;;  %p1818_p5 = scmp.lt.s32.totalorder %s1812_s13, %s1812_s13 }
  0x99   :  { %p1819_p6 = por %p1818_p5, %p1817_p4 }
  0x9b   :  { %p1820_p7 = pnand %p1819_p6, %p1813_p3 }
  0x9d   :  { %1823 = shalt.err (!%p1820_p7)
}
  0x9e   :  { %209 = dma.hbm_to_vmem [thread:$0]  %s2583_s15, 1024, %s204_s28, [#allocation27], %s2095_s7, %s2095_s7, %s2096_s22  }
  0x9f   :  { %s2603_s2 = sld [smem:[#allocation43_spill]] }
  0xa5   :  { %s1824_s27 = scalar_lea.hbm %s2603_s2, 128 }
  0xa6   :  { %p1825_p8 = scmp.ne.s32.totalorder %s2603_s2, %s1824_s27  ;;  %p1828_p9 = scmp.lt.u32.totalorder %s1824_s27, %s2603_s2 }
  0xa8   :  { %p1830_p10 = pnand %p1828_p9, %p1825_p8 }
  0xaa   :  { %1833 = shalt.err (!%p1830_p10)
}
  0xab   :  { %s1834_s24 = scalar_lea.vmem %s43_s30, 128  ;;  %p1839_p12 = scmp.lt.s32.totalorder %s43_s30, %s43_s30 }
  0xac   :  { %p1835_p11 = scmp.ne.s32.totalorder %s43_s30, %s1834_s24  ;;  %p1840_p13 = scmp.lt.s32.totalorder %s1834_s24, %s1834_s24 }
  0xae   :  { %p1841_p0 = por %p1840_p13, %p1839_p12 }
  0xb0   :  { %p1842_p1 = pnand %p1841_p0, %p1835_p11 }
  0xb2   :  { %1845 = shalt.err (!%p1842_p1)
}
  0xb3   :  { %45 = dma.hbm_to_vmem [thread:$0]  %s2603_s2, 128, %s43_s30, [#allocation3]  }
  0xb4   :  { %s2101_s29 = smov [#allocation7]   ;;  %s2102_s1 = smov [#allocation10]  }
  0xb5   :  { %s62_s21 = sshll.u32 %s2101_s29, 4  ;;  %s81_s13 = sshll.u32 %s2102_s1, 4  ;;  %s63_s21 = int_to_ptr.vmem [resolvable:$true] %s62_s21  ;;  %s82_s13 = int_to_ptr.vmem [resolvable:$true] %s81_s13 }
  0xb6   :  { %s2604_s25 = sld [smem:[#allocation45_spill]] }
  0xbc   :  { %s1846_s11 = scalar_lea.hbm %s2604_s25, 128 }
  0xbd   :  { %p1847_p2 = scmp.ne.s32.totalorder %s2604_s25, %s1846_s11  ;;  %p1850_p3 = scmp.lt.u32.totalorder %s1846_s11, %s2604_s25 }
  0xbf   :  { %p1852_p4 = pnand %p1850_p3, %p1847_p2 }
  0xc1   :  { %1855 = shalt.err (!%p1852_p4)
}
  0xc2   :  { %s1856_s30 = scalar_lea.vmem %s63_s21, 128  ;;  %p1861_p6 = scmp.lt.s32.totalorder %s63_s21, %s63_s21 }
  0xc3   :  { %p1857_p5 = scmp.ne.s32.totalorder %s63_s21, %s1856_s30  ;;  %p1862_p7 = scmp.lt.s32.totalorder %s1856_s30, %s1856_s30 }
  0xc5   :  { %p1863_p8 = por %p1862_p7, %p1861_p6 }
  0xc7   :  { %p1864_p9 = pnand %p1863_p8, %p1857_p5 }
  0xc9   :  { %1867 = shalt.err (!%p1864_p9)
}
  0xca   :  { %65 = dma.hbm_to_vmem [thread:$0]  %s2604_s25, 128, %s63_s21, [#allocation6]  }
  0xcb   :  { %s2605_s28 = sld [smem:[#allocation47_spill]] }
  0xd1   :  { %s1868_s29 = scalar_lea.hbm %s2605_s28, 256 }
  0xd2   :  { %p1869_p10 = scmp.ne.s32.totalorder %s2605_s28, %s1868_s29  ;;  %p1872_p11 = scmp.lt.u32.totalorder %s1868_s29, %s2605_s28 }
  0xd4   :  { %p1874_p12 = pnand %p1872_p11, %p1869_p10 }
  0xd6   :  { %1877 = shalt.err (!%p1874_p12)
}
  0xd7   :  { %s1878_s27 = scalar_lea.vmem %s82_s13, 256  ;;  %p1883_p0 = scmp.lt.s32.totalorder %s82_s13, %s82_s13 }
  0xd8   :  { %p1879_p13 = scmp.ne.s32.totalorder %s82_s13, %s1878_s27  ;;  %p1884_p1 = scmp.lt.s32.totalorder %s1878_s27, %s1878_s27 }
  0xda   :  { %p1885_p2 = por %p1884_p1, %p1883_p0 }
  0xdc   :  { %p1886_p3 = pnand %p1885_p2, %p1879_p13 }
  0xde   :  { %1889 = shalt.err (!%p1886_p3)
}
  0xdf   :  { %s2606_s21 = smov 128   ;;  %s2103_s26 = smov [#allocation13]  }
  0xe0   :  { %87 = dma.hbm_to_vmem [thread:$0]  %s2605_s28, 256, %s82_s13, [#allocation9], %s2606_s21, %s2606_s21, %s2094_s4  }
  0xe1   :  { %s104_s5 = sshll.u32 %s2103_s26, 4  ;;  %s2104_s30 = smov [#allocation16]   ;;  %s105_s5 = int_to_ptr.vmem [resolvable:$true] %s104_s5 }
  0xe2   :  { %s125_s2 = sshll.u32 %s2104_s30, 4  ;;  %s1890_s15 = scalar_lea.hbm %s2574_s6, 32  ;;  %s126_s2 = int_to_ptr.vmem [resolvable:$true] %s125_s2 }
  0xe3   :  { %p1891_p4 = scmp.ne.s32.totalorder %s2574_s6, %s1890_s15  ;;  %p1894_p5 = scmp.lt.u32.totalorder %s1890_s15, %s2574_s6 }
  0xe5   :  { %p1896_p6 = pnand %p1894_p5, %p1891_p4 }
  0xe7   :  { %1899 = shalt.err (!%p1896_p6)
}
  0xe8   :  { %s1900_s13 = scalar_lea.vmem %s105_s5, 32  ;;  %p1905_p8 = scmp.lt.s32.totalorder %s105_s5, %s105_s5 }
  0xe9   :  { %p1901_p7 = scmp.ne.s32.totalorder %s105_s5, %s1900_s13  ;;  %p1906_p9 = scmp.lt.s32.totalorder %s1900_s13, %s1900_s13 }
  0xeb   :  { %p1907_p10 = por %p1906_p9, %p1905_p8 }
  0xed   :  { %p1908_p11 = pnand %p1907_p10, %p1901_p7 }
  0xef   :  { %1911 = shalt.err (!%p1908_p11)
}
  0xf0   :  { %107 = dma.hbm_to_vmem [thread:$0]  %s2574_s6, 32, %s105_s5, [#allocation12]  }
  0xf1   :  { %s1912_s9 = scalar_lea.hbm %s2576_s8, 512 }
  0xf2   :  { %p1913_p12 = scmp.ne.s32.totalorder %s2576_s8, %s1912_s9  ;;  %p1916_p13 = scmp.lt.u32.totalorder %s1912_s9, %s2576_s8 }
  0xf4   :  { %p1918_p0 = pnand %p1916_p13, %p1913_p12 }
  0xf6   :  { %1921 = shalt.err (!%p1918_p0)
}
  0xf7   :  { %s1922_s15 = scalar_lea.vmem %s126_s2, 512  ;;  %p1927_p2 = scmp.lt.s32.totalorder %s126_s2, %s126_s2 }
  0xf8   :  { %p1923_p1 = scmp.ne.s32.totalorder %s126_s2, %s1922_s15  ;;  %p1928_p3 = scmp.lt.s32.totalorder %s1922_s15, %s1922_s15 }
  0xfa   :  { %p1929_p4 = por %p1928_p3, %p1927_p2 }
  0xfc   :  { %p1930_p5 = pnand %p1929_p4, %p1923_p1 }
  0xfe   :  { %1933 = shalt.err (!%p1930_p5)
}
  0xff   :  { %131 = dma.hbm_to_vmem [thread:$0]  %s2576_s8, 512, %s126_s2, [#allocation15], %s2606_s21, %s2606_s21, %s2094_s4  }
 0x100   :  { %s2105_s29 = smov [#allocation19]   ;;  %s2106_s3 = smov [#allocation22]  }
 0x101   :  { %s150_s1 = sshll.u32 %s2105_s29, 4  ;;  %s172_s23 = sshll.u32 %s2106_s3, 4  ;;  %s151_s1 = int_to_ptr.vmem [resolvable:$true] %s150_s1  ;;  %s173_s23 = int_to_ptr.vmem [resolvable:$true] %s172_s23 }
 0x102   :  { %s1934_s11 = scalar_lea.hbm %s2578_s10, 16 }
 0x103   :  { %p1935_p6 = scmp.ne.s32.totalorder %s2578_s10, %s1934_s11  ;;  %p1938_p7 = scmp.lt.u32.totalorder %s1934_s11, %s2578_s10 }
 0x105   :  { %p1940_p8 = pnand %p1938_p7, %p1935_p6 }
 0x107   :  { %1943 = shalt.err (!%p1940_p8)
}
 0x108   :  { %s1944_s8 = scalar_lea.vmem %s151_s1, 16  ;;  %s1948_s4 = scalar_lea.vmem %s151_s1, 32 }
 0x109   :  { %p1945_p9 = scmp.ne.s32.totalorder %s151_s1, %s1944_s8  ;;  %p1949_p10 = scmp.lt.s32.totalorder %s151_s1, %s151_s1 }
 0x10a   :  { %p1950_p11 = scmp.lt.s32.totalorder %s1948_s4, %s1944_s8 }
 0x10c   :  { %p1951_p12 = por %p1950_p11, %p1949_p10 }
 0x10e   :  { %p1952_p13 = pnand %p1951_p12, %p1945_p9 }
 0x110   :  { %1955 = shalt.err (!%p1952_p13)
}
 0x111   :  { %153 = dma.hbm_to_vmem [thread:$0]  %s2578_s10, 16, %s151_s1, [#allocation18]  }
 0x112   :  { %s1956_s24 = scalar_lea.hbm %s2580_s12, 16 }
 0x113   :  { %p1957_p0 = scmp.ne.s32.totalorder %s2580_s12, %s1956_s24  ;;  %p1960_p1 = scmp.lt.u32.totalorder %s1956_s24, %s2580_s12 }
 0x115   :  { %p1962_p2 = pnand %p1960_p1, %p1957_p0 }
 0x117   :  { %1965 = shalt.err (!%p1962_p2)
}
 0x118   :  { %s1966_s3 = scalar_lea.vmem %s173_s23, 16  ;;  %s1970_s13 = scalar_lea.vmem %s173_s23, 32 }
 0x119   :  { %p1967_p3 = scmp.ne.s32.totalorder %s173_s23, %s1966_s3  ;;  %p1971_p4 = scmp.lt.s32.totalorder %s173_s23, %s173_s23 }
 0x11a   :  { %p1972_p5 = scmp.lt.s32.totalorder %s1970_s13, %s1966_s3 }
 0x11c   :  { %p1973_p6 = por %p1972_p5, %p1971_p4 }
 0x11e   :  { %p1974_p7 = pnand %p1973_p6, %p1967_p3 }
 0x120   :  { %1977 = shalt.err (!%p1974_p7)
}
 0x121   :  { %175 = dma.hbm_to_vmem [thread:$0]  %s2580_s12, 16, %s173_s23, [#allocation21]  }
 0x122   :  { %s2107_s28 = smov [#allocation25]   ;;  %s2108_s27 = smov [#allocation28]  }
 0x123   :  { %s194_s11 = sshll.u32 %s2107_s28, 4  ;;  %s216_s25 = sshll.u32 %s2108_s27, 4  ;;  %s195_s11 = int_to_ptr.vmem [resolvable:$true] %s194_s11  ;;  %s217_s25 = int_to_ptr.vmem [resolvable:$true] %s216_s25 }
 0x124   :  { %s1978_s8 = scalar_lea.hbm %s2582_s14, 16 }
 0x125   :  { %p1979_p8 = scmp.ne.s32.totalorder %s2582_s14, %s1978_s8  ;;  %p1982_p9 = scmp.lt.u32.totalorder %s1978_s8, %s2582_s14 }
 0x127   :  { %p1984_p10 = pnand %p1982_p9, %p1979_p8 }
 0x129   :  { %1987 = shalt.err (!%p1984_p10)
}
 0x12a   :  { %s1988_s12 = scalar_lea.vmem %s195_s11, 16  ;;  %s1992_s23 = scalar_lea.vmem %s195_s11, 32 }
 0x12b   :  { %p1989_p11 = scmp.ne.s32.totalorder %s195_s11, %s1988_s12  ;;  %p1993_p12 = scmp.lt.s32.totalorder %s195_s11, %s195_s11 }
 0x12c   :  { %p1994_p13 = scmp.lt.s32.totalorder %s1992_s23, %s1988_s12 }
 0x12e   :  { %p1995_p0 = por %p1994_p13, %p1993_p12 }
 0x130   :  { %p1996_p1 = pnand %p1995_p0, %p1989_p11 }
 0x132   :  { %1999 = shalt.err (!%p1996_p1)
}
 0x133   :  { %197 = dma.hbm_to_vmem [thread:$0]  %s2582_s14, 16, %s195_s11, [#allocation24]  }
 0x134   :  { %s2000_s5 = scalar_lea.hbm %s2584_s16, 16 }
 0x135   :  { %p2001_p2 = scmp.ne.s32.totalorder %s2584_s16, %s2000_s5  ;;  %p2004_p3 = scmp.lt.u32.totalorder %s2000_s5, %s2584_s16 }
 0x137   :  { %p2006_p4 = pnand %p2004_p3, %p2001_p2 }
 0x139   :  { %2009 = shalt.err (!%p2006_p4)
}
 0x13a   :  { %s2010_s1 = scalar_lea.vmem %s217_s25, 16  ;;  %s2014_s28 = scalar_lea.vmem %s217_s25, 32 }
 0x13b   :  { %p2011_p5 = scmp.ne.s32.totalorder %s217_s25, %s2010_s1  ;;  %p2015_p6 = scmp.lt.s32.totalorder %s217_s25, %s217_s25 }
 0x13c   :  { %p2016_p7 = scmp.lt.s32.totalorder %s2014_s28, %s2010_s1 }
 0x13e   :  { %p2017_p8 = por %p2016_p7, %p2015_p6 }
 0x140   :  { %p2018_p9 = pnand %p2017_p8, %p2011_p5 }
 0x142   :  { %2021 = shalt.err (!%p2018_p9)
}
 0x143   :  { %219 = dma.hbm_to_vmem [thread:$0]  %s2584_s16, 16, %s217_s25, [#allocation27]  }
 0x144   :  { %s2109_s27 = smov [#allocation29]   ;;  %s2022_s4 = scalar_lea.hbm %s2586_s18, 1024 }
 0x145   :  { %s227_s9 = sshll.u32 %s2109_s27, 4  ;;  %p2023_p10 = scmp.ne.s32.totalorder %s2586_s18, %s2022_s4  ;;  %s228_s9 = int_to_ptr.vmem [resolvable:$true] %s227_s9 }
 0x146   :  { %p2026_p11 = scmp.lt.u32.totalorder %s2022_s4, %s2586_s18 }
 0x148   :  { %p2028_p12 = pnand %p2026_p11, %p2023_p10 }
 0x14a   :  { %2031 = shalt.err (!%p2028_p12)
}
 0x14b   :  { %s2032_s23 = scalar_lea.vmem %s228_s9, 1024  ;;  %p2037_p0 = scmp.lt.s32.totalorder %s228_s9, %s228_s9 }
 0x14c   :  { %p2033_p13 = scmp.ne.s32.totalorder %s228_s9, %s2032_s23  ;;  %p2038_p1 = scmp.lt.s32.totalorder %s2032_s23, %s2032_s23 }
 0x14e   :  { %p2039_p2 = por %p2038_p1, %p2037_p0 }
 0x150   :  { %p2040_p3 = pnand %p2039_p2, %p2033_p13 }
 0x152   :  { %2043 = shalt.err (!%p2040_p3)
}
 0x153   :  { %233 = dma.hbm_to_vmem [thread:$0]  %s2586_s18, 1024, %s228_s9, [#allocation30], %s2095_s7, %s2095_s7, %s2096_s22  }
 0x154   :  { %2066 = dma.done.wait [#allocation3], 128  }
 0x155   :  { %2067 = vsyncadd [#allocation3], 4294967168 }
 0x156   :  { %2068 = dma.done.wait [#allocation6], 256  }
 0x157   :  { %2069 = vsyncadd [#allocation6], 4294967040 }
 0x158   :  { %2070 = dma.done.wait [#allocation9], 384  }
 0x159   :  { %2071 = vsyncadd [#allocation9], 4294966912 }
 0x15a   :  { %2072 = dma.done.wait [#allocation12], 160  }
 0x15b   :  { %2073 = vsyncadd [#allocation12], 4294967136 }
 0x15c   :  { %2074 = dma.done.wait [#allocation15], 1024  }
 0x15d   :  { %2075 = vsyncadd [#allocation15], 4294966272 }
 0x15e   :  { %2076 = dma.done.wait [#allocation18], 1040  }
 0x15f   :  { %2077 = vsyncadd [#allocation18], 4294966256 }
 0x160   :  { %2078 = dma.done.wait [#allocation21], 1040  }
 0x161   :  { %2079 = vsyncadd [#allocation21], 4294966256 }
 0x162   :  { %2080 = dma.done.wait [#allocation24], 1040  }
 0x163   :  { %2081 = vsyncadd [#allocation24], 4294966256 }
 0x164   :  { %2082 = dma.done.wait [#allocation27], 1040  }
 0x165   :  { %2083 = vsyncadd [#allocation27], 4294966256 }
 0x166   :  { %2084 = dma.done.wait [#allocation30], 1024  }
 0x167   :  { %2085 = vsyncadd [#allocation30], 4294966272  ;;  %v2110_v0 = vmov 0   ;;  %v297_v1 = vld [vmem:[#allocation11] sm:$0xff]  ;;  %vm307_vm0 = vcmask 1043456   ;;  %v295_v6 = vld [vmem:[#allocation5] sm:$0xff]  ;;  %v412_v28 = vlaneseq }
 0x168   :  { %346 = vmatprep.mubr.bf16.mxu0 %v2110_v0  ;;  %401 = vmatprep.mubr.bf16.mxu1 %v2110_v0  ;;  %v1298_v2 = vcombine.high %v297_v1, %v297_v1  ;;  %v1572_v3 = vld [vmem:[#allocation10 + $0x4] ss:$8 sps:$4 sm:$0xff]   ;;  %v1297_v4 = vcombine.low %v297_v1, %v297_v1  ;;  %v1575_v5 = vld [vmem:[#allocation10] ss:$8 sps:$4 sm:$0xff]   ;;  %v296_v9 = vpack.c.bf16 %v295_v6, %v295_v6  ;;  %vm303_vm1 = vcmask 64512   ;;  %v430_v18 = vld [vmem:[#allocation8] sm:$0xff] }
 0x169   :  { %v291_v7 = vld [vmem:[#allocation2] sm:$0xff]  ;;  %369 = vmatprep.subr.bf16.mxu1 %v1572_v3  ;;  %vm365_vm2 = vcmask 130048   ;;  %v1584_v15 = vld [vmem:[#allocation16 + $0x14] ss:$8 sps:$4 sm:$0xff]   ;;  %v1582_v17 = vld [vmem:[#allocation16 + $0x10] ss:$8 sps:$4 sm:$0xff]   ;;  %v431_v21 = vpack.c.bf16 %v430_v18, %v430_v18 }
 0x16a   :  { %1299 = vmatprep.subr.msk.bf16.mxu0 %vm307_vm0, %v1298_v2  ;;  %v309_v8 = vsel %vm307_vm0, %v1297_v4, 0  ;;  %v292_v10 = vpack.c.bf16 %v291_v7, %v291_v7  ;;  %370 = vmatpush1.bf16.msra.mxu1 %v1575_v5  ;;  %v1576_v11 = vld [vmem:[#allocation16] ss:$8 sps:$4 sm:$0xff]   ;;  %v1578_v12 = vld [vmem:[#allocation16 + $0x4] ss:$8 sps:$4 sm:$0xff]   ;;  %v424_v20 = vld [vmem:[#allocation7] sm:$0xff] }
 0x16b   :  { %315 = vmatpush1.bf16.msra.mxu0 %v309_v8  ;;  %v1579_v13 = vld [vmem:[#allocation14] ss:$8 sps:$4 sm:$0xff]   ;;  %v1581_v14 = vld [vmem:[#allocation14 + $0x4] ss:$8 sps:$4 sm:$0xff]   ;;  %v1587_v16 = vld [vmem:[#allocation14 + $0x14] ss:$8 sps:$4 sm:$0xff]   ;;  %v425_v22 = vpack.c.bf16 %v424_v20, %v424_v20 }
 0x16c   :  { %460 = vmatprep.subr.bf16.mxu0 %v1578_v12  ;;  %524 = vmatprep.subr.bf16.mxu1 %v1581_v14  ;;  %v1585_v19 = vld [vmem:[#allocation14 + $0x10] ss:$8 sps:$4 sm:$0xff]   ;;  %vm456_vm3 = vcmask 261120   ;;  %v1588_v23 = vld [vmem:[#allocation17] sm:$0xff]   ;;  %v2111_v24 = vmov 0.0   ;;  %v1589_v25 = vld [vmem:[#allocation17 + $0x8] sm:$0xff]  }
 0x16d   :  { %1303 = vmatmul.mubr.msk.bf16.vlgmr.msra.gmra.mrb[0].mxu1 %vm365_vm2, %v292_v10  ;;  %v1590_v26 = vld [vmem:[#allocation17 + $0x10] sm:$0xff]   ;;  %v1591_v27 = vld [vmem:[#allocation17 + $0x18] sm:$0xff]   ;;  %v413_v29 = vshrl.u32 %v412_v28, 7  ;;  %v1592_v49 = vld [vmem:[#allocation17 + $0x20] sm:$0xff]   ;;  %vm2112_vm4 = vmmov 0   ;;  %s2113_s9 = smov [#allocation31]  }
 0x16e   :  { %1300 = vmatmul.mubr.msk.bf16.vlgmr.msra.gmra.mrb[0].mxu0 %vm303_vm1, %v296_v9  ;;  %556 = vmatprep.mubr.bf16.mxu1 %v2110_v0  ;;  %v410_v31 = vld [vmem:[#allocation13] sm:$0x3]  ;;  %v1593_v50 = vld [vmem:[#allocation17 + $0x28] sm:$0xff]   ;;  %v1594_v51 = vld [vmem:[#allocation17 + $0x30] sm:$0xff]   ;;  %s1279_s26 = sshll.u32 %s2113_s9, 4  ;;  %s1280_s26 = int_to_ptr.vmem [resolvable:$true] %s1279_s26 }
 0x16f   :  { %492 = vmatprep.mubr.bf16.mxu0 %v2110_v0  ;;  %461 = vmatpush1.bf16.msra.mxu0 %v1576_v11  ;;  %v414_v30 = vsub.s32 0, %v413_v29  ;;  %v418_v32 = vsub.s32 1, %v413_v29  ;;  %v1595_v52 = vld [vmem:[#allocation17 + $0x38] sm:$0xff]   ;;  %v1604_v53 = vld [vmem:[#allocation23] sm:$0xff]   ;;  %v1605_v54 = vld [vmem:[#allocation23 + $0x8] sm:$0xff]   ;;  %s2044_s8 = scalar_lea.vmem %s1280_s26, 128  ;;  %p2049_p5 = scmp.lt.s32.totalorder %s1280_s26, %s1280_s26 }
 0x170   :  { %525 = vmatpush1.bf16.msra.mxu1 %v1579_v13  ;;  %462 = vmatprep.subr.bf16.mxu0 %v1584_v15  ;;  %v1596_v6 = vld [vmem:[#allocation20] sm:$0xff]   ;;  %v1597_v8 = vld [vmem:[#allocation20 + $0x8] sm:$0xff]   ;;  %v1598_v11 = vld [vmem:[#allocation20 + $0x10] sm:$0xff]   ;;  %p2045_p4 = scmp.ne.s32.totalorder %s1280_s26, %s2044_s8  ;;  %p2050_p6 = scmp.lt.s32.totalorder %s2044_s8, %s2044_s8 }
 0x171   :  { %526 = vmatprep.subr.bf16.mxu1 %v1587_v16  ;;  %v415_v33 = vrot.slane %v410_v31, %v414_v30  ;;  %v419_v39 = vrot.slane %v410_v31, %v418_v32  ;;  %v1599_v13 = vld [vmem:[#allocation20 + $0x18] sm:$0xff]   ;;  %v1600_v14 = vld [vmem:[#allocation20 + $0x20] sm:$0xff]   ;;  %v1601_v15 = vld [vmem:[#allocation20 + $0x28] sm:$0xff]  }
 0x172   :  { %v1602_v16 = vld [vmem:[#allocation20 + $0x30] sm:$0xff]   ;;  %v1603_v18 = vld [vmem:[#allocation20 + $0x38] sm:$0xff]   ;;  %p2051_p7 = por %p2050_p6, %p2049_p5 }
 0x173   :  { %463 = vmatpush1.bf16.msra.mxu0 %v1582_v17  ;;  %v1322_v29 = vld [vmem:[#allocation19] ss:$0 sm:$0xff] }
 0x174   :  { %527 = vmatpush1.bf16.msra.mxu1 %v1585_v19  ;;  %1425 = vmatprep.subr.bf16.mxu0 %v2111_v24  ;;  %p2052_p8 = pnand %p2051_p7, %p2045_p4 }
 0x175   :  { %1445 = vmatprep.subr.bf16.mxu1 %v2111_v24 }
 0x176   :  { %1308 = vmatmul.mubr.msk.bf16.vlgmr.msra.gmra.mrb[4].mxu0 %vm456_vm3, %v431_v21  ;;  %v1606_v21 = vld [vmem:[#allocation23 + $0x10] sm:$0xff]  }
 0x177   :  { %1313 = vmatmul.mubr.msk.bf16.vlgmr.msra.gmra.mrb[4].mxu1 %vm456_vm3, %v425_v22  ;;  %1426 = vmatpush3.bf16.msra.mxu0 %v1588_v23  ;;  %v1607_v22 = vld [vmem:[#allocation23 + $0x18] sm:$0xff]   ;;  %v1608_v23 = vld [vmem:[#allocation23 + $0x20] sm:$0xff]  }
 0x178   :  { %1427 = vmatprep.subr.bf16.mxu0 %v2111_v24  ;;  %1441 = vmatprep.mubr.msk.bf16.mxu0 %vm2112_vm4, %v2111_v24 }
 0x179   :  { %1461 = vmatprep.mubr.msk.bf16.mxu1 %vm2112_vm4, %v2111_v24  ;;  %1446 = vmatpush3.bf16.msra.mxu1 %v1604_v53  ;;  %v1616_v53 = vld [vmem:[#allocation26 + $0x20] sm:$0xff]  }
 0x17a   :  { %1447 = vmatprep.subr.bf16.mxu1 %v2111_v24 }
 0x17b   :  { %1428 = vmatpush3.bf16.msra.mxu0 %v1589_v25  ;;  %v1609_v25 = vld [vmem:[#allocation23 + $0x28] sm:$0xff]  }
 0x17c   :  { %1429 = vmatprep.subr.bf16.mxu0 %v2111_v24 }
 0x17d   :  { %1448 = vmatpush3.bf16.msra.mxu1 %v1605_v54 }
 0x17e   :  { %1449 = vmatprep.subr.bf16.mxu1 %v2111_v24 }
 0x17f   :  { %1430 = vmatpush3.bf16.msra.mxu0 %v1590_v26  ;;  %v1610_v26 = vld [vmem:[#allocation23 + $0x30] sm:$0xff]  }
 0x180   :  { %1431 = vmatprep.subr.bf16.mxu0 %v2111_v24 }
 0x181   :  { %1450 = vmatpush3.bf16.msra.mxu1 %v1606_v21 }
 0x182   :  { %1451 = vmatprep.subr.bf16.mxu1 %v2111_v24 }
 0x183   :  { %1432 = vmatpush3.bf16.msra.mxu0 %v1591_v27  ;;  %v1611_v27 = vld [vmem:[#allocation23 + $0x38] sm:$0xff]  }
 0x184   :  { %1433 = vmatprep.subr.bf16.mxu0 %v2111_v24 }
 0x185   :  { %1452 = vmatpush3.bf16.msra.mxu1 %v1607_v22 }
 0x186   :  { %1453 = vmatprep.subr.bf16.mxu1 %v2111_v24 }
 0x187   :  { %1434 = vmatpush3.bf16.msra.mxu0 %v1592_v49  ;;  %v1615_v49 = vld [vmem:[#allocation26 + $0x18] sm:$0xff]  }
 0x188   :  { %1435 = vmatprep.subr.bf16.mxu0 %v2111_v24 }
 0x189   :  { %1454 = vmatpush3.bf16.msra.mxu1 %v1608_v23 }
 0x18a   :  { %1455 = vmatprep.subr.bf16.mxu1 %v2111_v24 }
 0x18b   :  { %1436 = vmatpush3.bf16.msra.mxu0 %v1593_v50 }
 0x18c   :  { %1437 = vmatprep.subr.bf16.mxu0 %v2111_v24 }
 0x18d   :  { %1456 = vmatpush3.bf16.msra.mxu1 %v1609_v25 }
 0x18e   :  { %1457 = vmatprep.subr.bf16.mxu1 %v2111_v24 }
 0x18f   :  { %1438 = vmatpush3.bf16.msra.mxu0 %v1594_v51 }
 0x190   :  { %1439 = vmatprep.subr.bf16.mxu0 %v2111_v24 }
 0x191   :  { %1458 = vmatpush3.bf16.msra.mxu1 %v1610_v26 }
 0x192   :  { %1459 = vmatprep.subr.bf16.mxu1 %v2111_v24 }
 0x193   :  { %1440 = vmatpush3.bf16.msra.mxu0 %v1595_v52 }
 0x194   :  { %1465 = vmatprep.subr.bf16.mxu0 %v2111_v24 }
 0x195   :  { %1460 = vmatpush3.bf16.msra.mxu1 %v1611_v27  ;;  %v1344_v27 = vld [vmem:[#allocation28] ss:$0 sm:$0xff] }
 0x196   :  { %1485 = vmatprep.subr.bf16.mxu1 %v2111_v24 }
 0x240   :  { %v403_v35 = vpop.f32.mrb[0].mxu1 }
 0x241   :  { %v348_v34 = vpop.f32.mrb[0].mxu0  ;;  %v405_v38 = vpop.f32.mrb[1].mxu1 }
 0x242   :  { %v404_v36 = vadd.f32 %v403_v35, %v348_v34  ;;  %v350_v37 = vpop.f32.mrb[1].mxu0  ;;  %v407_v42 = vpop.f32.mrb[2].mxu1 }
 0x243   :  { %v406_v40 = vadd.f32 %v405_v38, %v350_v37  ;;  %v352_v41 = vpop.f32.mrb[2].mxu0  ;;  %v408_v44 = vpop.f32.mrb[3].mxu1  ;;  %v1613_v42 = vld [vmem:[#allocation26 + $0x8] sm:$0xff]  }
 0x244   :  { %v353_v43 = vpop.f32.mrb[3].mxu0  ;;  %v422_v45 = vadd.f32 %v415_v33, %v404_v36 }
 0x245   :  { %v2465_v46 = vadd.f32 %v419_v39, %v406_v40  ;;  %v1612_v40 = vld [vmem:[#allocation26] sm:$0xff]   ;;  %v1614_v43 = vld [vmem:[#allocation26 + $0x10] sm:$0xff]  }
 0x246   :  { %v565_v47 = vand.u32 2147483647, %v422_v45 }
 0x247   :  { %v827_v48 = vand.u32 2147483647, %v2465_v46 }
 0x248   :  { %566 = vadd.xlane.f32.xlu0 %v565_v47 }
 0x249   :  { %v494_v55 = vpop.f32.mrb[4].mxu0 }
 0x24a   :  { %v496_v56 = vpop.f32.mrb[5].mxu0  ;;  %v558_v57 = vpop.f32.mrb[4].mxu1 }
 0x24b   :  { %v498_v58 = vpop.f32.mrb[6].mxu0  ;;  %v2478_v59 = vadd.f32 %v558_v57, %v494_v55  ;;  %v560_v60 = vpop.f32.mrb[5].mxu1  ;;  %v1617_v55 = vld [vmem:[#allocation26 + $0x28] sm:$0xff]   ;;  %v1619_v57 = vld [vmem:[#allocation26 + $0x38] sm:$0xff]  }
 0x24c   :  { %828 = vadd.xlane.f32.xlu0 %v827_v48  ;;  %v499_v61 = vpop.f32.mrb[7].mxu0  ;;  %v2480_v62 = vadd.f32 %v560_v60, %v496_v56  ;;  %v562_v63 = vpop.f32.mrb[6].mxu1  ;;  %v1618_v56 = vld [vmem:[#allocation26 + $0x30] sm:$0xff]  }
 0x24d   :  { %v563_v0 = vpop.f32.mrb[7].mxu1  ;;  %v1620_v61 = vld [vmem:[%s2585_s17] sm:$0xff]   ;;  %v1621_v63 = vld [vmem:[%s2585_s17 + $0x8] sm:$0xff]  }
 0x24e   :  { %v1622_v0 = vld [vmem:[%s2585_s17 + $0x10] sm:$0xff]  }
 0x2d5   :  { %v567_v1 = vpop.xlane.xlu0 %566 }
 0x2d6   :  { %v569_v2 = vmul.f32 0.0078125, %v567_v1  ;;  %v1623_v1 = vld [vmem:[%s2585_s17 + $0x18] sm:$0xff]  }
 0x2d8   :  { %v570_v3 = vmax.f32 %v569_v2, 1e-08  ;;  %v1624_v2 = vld [vmem:[%s2585_s17 + $0x20] sm:$0xff]  }
 0x2d9   :  { %v829_v9 = vpop.xlane.xlu0 %828 }
 0x2da   :  { %1636 = vrcp.f32 %v570_v3  ;;  %v830_v10 = vmul.f32 0.0078125, %v829_v9  ;;  %v1625_v3 = vld [vmem:[%s2585_s17 + $0x28] sm:$0xff]   ;;  %v1631_v9 = vld [vmem:[#allocation29 + $0x18] sm:$0xff]  }
 0x2dc   :  { %v831_v12 = vmax.f32 %v830_v10, 1e-08  ;;  %v1632_v10 = vld [vmem:[#allocation29 + $0x20] sm:$0xff]  }
 0x2de   :  { %1638 = vrcp.f32 %v831_v12  ;;  %v1634_v12 = vld [vmem:[#allocation29 + $0x30] sm:$0xff]  }
 0x2e4   :  { %v1637_v4 = vpop.eup %1636 }
 0x2e5   :  { %v572_v5 = vmul.f32 %v1637_v4, %v422_v45  ;;  %v1342_v45 = vld [vmem:[#allocation22] ss:$0 sm:$0xff]  ;;  %v1626_v4 = vld [vmem:[%s2585_s17 + $0x30] sm:$0xff]  }
 0x2e7   :  { %v573_v7 = vpack.c.bf16 %v572_v5, %v572_v5  ;;  %v1627_v5 = vld [vmem:[%s2585_s17 + $0x38] sm:$0xff]  }
 0x2e8   :  { %v1639_v17 = vpop.eup %1638 }
 0x2e9   :  { %1442 = vmatmul.mubr.bf16.vlgmr.msra.gmra.mrb[8].mxu0 %v573_v7  ;;  %v833_v19 = vmul.f32 %v1639_v17, %v2465_v46  ;;  %v1629_v7 = vld [vmem:[#allocation29 + $0x8] sm:$0xff]  }
 0x2ea   :  { %1466 = vmatpush3.bf16.msra.mxu0 %v1596_v6  ;;  %1481 = vmatprep.mubr.msk.bf16.mxu0 %vm2112_vm4, %v2111_v24  ;;  %v1628_v6 = vld [vmem:[#allocation29] sm:$0xff]  }
 0x2eb   :  { %1467 = vmatprep.subr.bf16.mxu0 %v2111_v24  ;;  %v834_v20 = vpack.c.bf16 %v833_v19, %v833_v19 }
 0x2ee   :  { %1468 = vmatpush3.bf16.msra.mxu0 %v1597_v8  ;;  %v1630_v8 = vld [vmem:[#allocation29 + $0x10] sm:$0xff]  }
 0x2ef   :  { %1469 = vmatprep.subr.bf16.mxu0 %v2111_v24 }
 0x2f2   :  { %1470 = vmatpush3.bf16.msra.mxu0 %v1598_v11  ;;  %v1633_v11 = vld [vmem:[#allocation29 + $0x28] sm:$0xff]  }
 0x2f3   :  { %1471 = vmatprep.subr.bf16.mxu0 %v2111_v24 }
 0x2f6   :  { %1472 = vmatpush3.bf16.msra.mxu0 %v1599_v13  ;;  %v1635_v13 = vld [vmem:[#allocation29 + $0x38] sm:$0xff]  }
 0x2f7   :  { %1473 = vmatprep.subr.bf16.mxu0 %v2111_v24 }
 0x2fa   :  { %1474 = vmatpush3.bf16.msra.mxu0 %v1600_v14  ;;  %v1324_v14 = vld [vmem:[#allocation25] ss:$0 sm:$0xff] }
 0x2fb   :  { %1475 = vmatprep.subr.bf16.mxu0 %v2111_v24 }
 0x2fe   :  { %1476 = vmatpush3.bf16.msra.mxu0 %v1601_v15 }
 0x2ff   :  { %1477 = vmatprep.subr.bf16.mxu0 %v2111_v24 }
 0x302   :  { %1478 = vmatpush3.bf16.msra.mxu0 %v1602_v16 }
 0x303   :  { %1479 = vmatprep.subr.bf16.mxu0 %v2111_v24 }
 0x306   :  { %1480 = vmatpush3.bf16.msra.mxu0 %v1603_v18 }
 0x307   :  { %1505 = vmatprep.subr.bf16.mxu0 %v2111_v24 }
 0x309   :  { %1482 = vmatmul.mubr.bf16.vlgmr.msra.gmra.mrb[12].mxu0 %v834_v20 }
 0x30a   :  { %1521 = vmatprep.mubr.msk.bf16.mxu0 %vm2112_vm4, %v2111_v24  ;;  %1506 = vmatpush3.bf16.msra.mxu0 %v1628_v6 }
 0x30b   :  { %1507 = vmatprep.subr.bf16.mxu0 %v2111_v24 }
 0x30e   :  { %1508 = vmatpush3.bf16.msra.mxu0 %v1629_v7 }
 0x30f   :  { %1509 = vmatprep.subr.bf16.mxu0 %v2111_v24 }
 0x312   :  { %1510 = vmatpush3.bf16.msra.mxu0 %v1630_v8 }
 0x313   :  { %1511 = vmatprep.subr.bf16.mxu0 %v2111_v24 }
 0x316   :  { %1512 = vmatpush3.bf16.msra.mxu0 %v1631_v9 }
 0x317   :  { %1513 = vmatprep.subr.bf16.mxu0 %v2111_v24 }
 0x31a   :  { %1514 = vmatpush3.bf16.msra.mxu0 %v1632_v10 }
 0x31b   :  { %1515 = vmatprep.subr.bf16.mxu0 %v2111_v24 }
 0x31e   :  { %1516 = vmatpush3.bf16.msra.mxu0 %v1633_v11 }
 0x31f   :  { %1517 = vmatprep.subr.bf16.mxu0 %v2111_v24 }
 0x322   :  { %1518 = vmatpush3.bf16.msra.mxu0 %v1634_v12 }
 0x323   :  { %1519 = vmatprep.subr.bf16.mxu0 %v2111_v24 }
 0x326   :  { %1520 = vmatpush3.bf16.msra.mxu0 %v1635_v13 }
 0x3bc   :  { %v672_v28 = vpop.f32.mrb[8].mxu0 }
 0x3bd   :  { %v673_v30 = vadd.f32 %v672_v28, %v2478_v59  ;;  %v1443_v31 = vpop.f32.mrb[9].mxu0 }
 0x3be   :  { %v675_v32 = vpop.f32.mrb[10].mxu0 }
 0x3bf   :  { %v685_v33 = vadd.f32 %v1322_v29, %v673_v30  ;;  %v1444_v34 = vpop.f32.mrb[11].mxu0 }
 0x3c1   :  { %v687_v35 = vmin.f32 %v685_v33, 0.0  ;;  %vm686_vm5 = vcmp.gt.f32.partialorder %v685_v33, 0.0 }
 0x3c3   :  { %v688_v36 = vmul.f32 1.442695, %v687_v35 }
 0x3c5   :  { %1640 = vpow2.f32 %v688_v36 }
 0x3cf   :  { %v1641_v37 = vpop.eup %1640 }
 0x3d0   :  { %v1323_v38 = vadd.f32 -1.0, %v1641_v37 }
 0x3d2   :  { %v691_v39 = vsel %vm686_vm5, %v685_v33, %v1323_v38 }
 0x3d3   :  { %v692_v41 = vpack.c.bf16 %v691_v39, %v691_v39 }
 0x3d5   :  { %1462 = vmatmul.mubr.bf16.vlgmr.msra.gmra.mrb[8].mxu1 %v692_v41 }
 0x3d6   :  { %1486 = vmatpush3.bf16.msra.mxu1 %v1612_v40  ;;  %1501 = vmatprep.mubr.msk.bf16.mxu1 %vm2112_vm4, %v2111_v24 }
 0x3d7   :  { %1487 = vmatprep.subr.bf16.mxu1 %v2111_v24 }
 0x3da   :  { %1488 = vmatpush3.bf16.msra.mxu1 %v1613_v42 }
 0x3db   :  { %1489 = vmatprep.subr.bf16.mxu1 %v2111_v24 }
 0x3dc   :  { %v933_v44 = vpop.f32.mrb[12].mxu0 }
 0x3dd   :  { %v934_v46 = vadd.f32 %v933_v44, %v2480_v62  ;;  %v1483_v47 = vpop.f32.mrb[13].mxu0 }
 0x3de   :  { %v936_v48 = vpop.f32.mrb[14].mxu0  ;;  %1490 = vmatpush3.bf16.msra.mxu1 %v1614_v43  ;;  %v1370_v43 = vld [vmem:[%s2587_s19] ss:$0 sm:$0xff] }
 0x3df   :  { %v946_v50 = vadd.f32 %v1342_v45, %v934_v46  ;;  %v1484_v51 = vpop.f32.mrb[15].mxu0  ;;  %1491 = vmatprep.subr.bf16.mxu1 %v2111_v24 }
 0x3e1   :  { %v948_v52 = vmin.f32 %v946_v50, 0.0  ;;  %vm947_vm6 = vcmp.gt.f32.partialorder %v946_v50, 0.0 }
 0x3e2   :  { %1492 = vmatpush3.bf16.msra.mxu1 %v1615_v49 }
 0x3e3   :  { %v949_v54 = vmul.f32 1.442695, %v948_v52  ;;  %1493 = vmatprep.subr.bf16.mxu1 %v2111_v24 }
 0x3e5   :  { %1642 = vpow2.f32 %v949_v54 }
 0x3e6   :  { %1494 = vmatpush3.bf16.msra.mxu1 %v1616_v53 }
 0x3e7   :  { %1495 = vmatprep.subr.bf16.mxu1 %v2111_v24 }
 0x3ea   :  { %1496 = vmatpush3.bf16.msra.mxu1 %v1617_v55 }
 0x3eb   :  { %1497 = vmatprep.subr.bf16.mxu1 %v2111_v24 }
 0x3ee   :  { %1498 = vmatpush3.bf16.msra.mxu1 %v1618_v56 }
 0x3ef   :  { %v1643_v58 = vpop.eup %1642  ;;  %1499 = vmatprep.subr.bf16.mxu1 %v2111_v24 }
 0x3f0   :  { %v1343_v59 = vadd.f32 -1.0, %v1643_v58 }
 0x3f2   :  { %v952_v60 = vsel %vm947_vm6, %v946_v50, %v1343_v59  ;;  %1500 = vmatpush3.bf16.msra.mxu1 %v1619_v57 }
 0x3f3   :  { %v953_v62 = vpack.c.bf16 %v952_v60, %v952_v60  ;;  %1525 = vmatprep.subr.bf16.mxu1 %v2111_v24 }
 0x3f5   :  { %1502 = vmatmul.mubr.bf16.vlgmr.msra.gmra.mrb[12].mxu1 %v953_v62 }
 0x3f6   :  { %1526 = vmatpush3.bf16.msra.mxu1 %v1620_v61  ;;  %1541 = vmatprep.mubr.msk.bf16.mxu1 %vm2112_vm4, %v2111_v24 }
 0x3f7   :  { %1527 = vmatprep.subr.bf16.mxu1 %v2111_v24 }
 0x3fa   :  { %1528 = vmatpush3.bf16.msra.mxu1 %v1621_v63 }
 0x3fb   :  { %1529 = vmatprep.subr.bf16.mxu1 %v2111_v24 }
 0x3fe   :  { %1530 = vmatpush3.bf16.msra.mxu1 %v1622_v0 }
 0x3ff   :  { %1531 = vmatprep.subr.bf16.mxu1 %v2111_v24 }
 0x402   :  { %1532 = vmatpush3.bf16.msra.mxu1 %v1623_v1 }
 0x403   :  { %1533 = vmatprep.subr.bf16.mxu1 %v2111_v24 }
 0x406   :  { %1534 = vmatpush3.bf16.msra.mxu1 %v1624_v2 }
 0x407   :  { %1535 = vmatprep.subr.bf16.mxu1 %v2111_v24 }
 0x40a   :  { %1536 = vmatpush3.bf16.msra.mxu1 %v1625_v3 }
 0x40b   :  { %1537 = vmatprep.subr.bf16.mxu1 %v2111_v24 }
 0x40e   :  { %1538 = vmatpush3.bf16.msra.mxu1 %v1626_v4 }
 0x40f   :  { %1539 = vmatprep.subr.bf16.mxu1 %v2111_v24 }
 0x412   :  { %1540 = vmatpush3.bf16.msra.mxu1 %v1627_v5 }
 0x4a8   :  { %v798_v15 = vpop.f32.mrb[8].mxu1 }
 0x4a9   :  { %v799_v16 = vadd.f32 %v1324_v14, %v798_v15  ;;  %v1463_v17 = vpop.f32.mrb[9].mxu1 }
 0x4aa   :  { %v801_v18 = vpop.f32.mrb[10].mxu1 }
 0x4ab   :  { %v805_v19 = vmin.f32 %v799_v16, 0.0  ;;  %v1464_v20 = vpop.f32.mrb[11].mxu1  ;;  %vm804_vm7 = vcmp.gt.f32.partialorder %v799_v16, 0.0 }
 0x4ad   :  { %v806_v21 = vmul.f32 1.442695, %v805_v19 }
 0x4af   :  { %1644 = vpow2.f32 %v806_v21 }
 0x4b9   :  { %v1645_v22 = vpop.eup %1644 }
 0x4ba   :  { %v1333_v23 = vadd.f32 -1.0, %v1645_v22 }
 0x4bc   :  { %v809_v25 = vsel %vm804_vm7, %v799_v16, %v1333_v23 }
 0x4bd   :  { %v810_v26 = vpack.c.bf16 %v809_v25, %v809_v25 }
 0x4bf   :  { %1542 = vmatmul.mubr.bf16.vlgmr.msra.gmra.mrb[16].mxu1 %v810_v26 }
 0x4c8   :  { %v1059_v28 = vpop.f32.mrb[12].mxu1 }
 0x4c9   :  { %v1060_v24 = vadd.f32 %v1344_v27, %v1059_v28  ;;  %v1503_v29 = vpop.f32.mrb[13].mxu1 }
 0x4ca   :  { %v1062_v30 = vpop.f32.mrb[14].mxu1 }
 0x4cb   :  { %v1066_v31 = vmin.f32 %v1060_v24, 0.0  ;;  %v1504_v32 = vpop.f32.mrb[15].mxu1  ;;  %vm1065_vm8 = vcmp.gt.f32.partialorder %v1060_v24, 0.0 }
 0x4cd   :  { %v1067_v33 = vmul.f32 1.442695, %v1066_v31 }
 0x4cf   :  { %1646 = vpow2.f32 %v1067_v33 }
 0x4d9   :  { %v1647_v34 = vpop.eup %1646 }
 0x4da   :  { %v1353_v35 = vadd.f32 -1.0, %v1647_v34 }
 0x4dc   :  { %v1070_v36 = vsel %vm1065_vm8, %v1060_v24, %v1353_v35 }
 0x4dd   :  { %v1071_v37 = vpack.c.bf16 %v1070_v36, %v1070_v36 }
 0x4df   :  { %1522 = vmatmul.mubr.bf16.vlgmr.msra.gmra.mrb[16].mxu0 %v1071_v37 }
 0x592   :  { %v1258_v38 = vpop.f32.mrb[16].mxu1 }
 0x593   :  { %v1543_v39 = vpop.f32.mrb[17].mxu1 }
 0x594   :  { %v1261_v40 = vpop.f32.mrb[18].mxu1 }
 0x595   :  { %v1544_v41 = vpop.f32.mrb[19].mxu1 }
 0x5b2   :  { %v1170_v42 = vpop.f32.mrb[16].mxu0 }
 0x5b3   :  { %v1259_v44 = vadd.f32 %v1258_v38, %v1170_v42  ;;  %v1523_v45 = vpop.f32.mrb[17].mxu0 }
 0x5b4   :  { %v1173_v46 = vpop.f32.mrb[18].mxu0 }
 0x5b5   :  { %v1271_v47 = vadd.f32 %v1370_v43, %v1259_v44  ;;  %v1524_v48 = vpop.f32.mrb[19].mxu0 }
 0x5b7   :  { %1272 = vst [vmem:[#allocation31] sm:$0xff] %v1271_v47 }
 0x5b8   :  { %2055 = shalt.err (!%p2052_p8)
}
 0x5b9   :  { %s2056_s19 = scalar_lea.hbm %s2588_s20, 128 }
 0x5ba   :  { %p2057_p9 = scmp.ne.s32.totalorder %s2588_s20, %s2056_s19  ;;  %p2060_p10 = scmp.lt.u32.totalorder %s2056_s19, %s2588_s20 }
 0x5bc   :  { %p2062_p11 = pnand %p2060_p10, %p2057_p9 }
 0x5be   :  { %2065 = shalt.err (!%p2062_p11)
}
 0x5bf   :  { %1282 = dma.vmem_to_hbm [thread:$0]  %s1280_s26, 128, %s2588_s20, [#allocation4]  }
 0x5c0   :  { %2086 = dma.done.wait [#allocation4], 128  }
 0x5c1   :  { %2087 = vsyncadd [#allocation4], 4294967168 }
 0x5c2   :  { %1286 = vsyncpa [#allocation3], 1 }
 0x5c3   :  { %1287 = vsyncpa [#allocation6], 1 }
 0x5c4   :  { %1288 = vsyncpa [#allocation9], 1 }
 0x5c5   :  { %1289 = vsyncpa [#allocation12], 1 }
 0x5c6   :  { %1290 = vsyncpa [#allocation15], 1 }
 0x5c7   :  { %1291 = vsyncpa [#allocation18], 1 }
 0x5c8   :  { %1292 = vsyncpa [#allocation21], 1 }
 0x5c9   :  { %1293 = vsyncpa [#allocation24], 1 }
 0x5ca   :  { %1294 = vsyncpa [#allocation27], 1 }
 0x5cb   :  { %1295 = vsyncpa [#allocation30], 1 }
 0x5cc   :  { %1296 = vsyncpa [#allocation4], 1 }

</bundles_post_ra>
